<compile_context>
chip_gen: v5e
topology: v5e:2x2
jax: 0.10.0
libtpu: 0.0.40
codegen_flags: <defaults>
</compile_context>

<pallas_src>
import jax
import jax.numpy as jnp
from jax.experimental import pallas as pl
from jax.experimental.pallas import tpu as pltpu

_LANE = 128
_SUBLANE = 8  # f32 sublane tile; x / output stay f32 in this design


def _round_up(n, m):
    return ((n + m - 1) // m) * m


def _cdiv(a, b):
    return (a + b - 1) // b


# --------------------------------------------------------------------------
# Kernel
# --------------------------------------------------------------------------
def _make_fused_mlp_kernel(n_layers, compute_dtype):
    """o = relu(...relu(relu(x@W1+b1)@W2+b2)...) — whole chain in VMEM/vregs."""

    def kernel(x_ref, *refs):
        o_ref = refs[-1]
        wb = refs[:-1]
        # Cast activations to the compute dtype in-vreg (free VPU op); avoids a
        # wrapper-side HBM round-trip for a bf16 copy of x.
        h = x_ref[...].astype(compute_dtype)
        for l in range(n_layers):
            w = wb[2 * l][...]
            b = wb[2 * l + 1][...]                     # (1, out) broadcasts over rows
            z = jnp.dot(h, w, preferred_element_type=jnp.float32)
            z = z + b.astype(jnp.float32)
            z = jnp.maximum(z, 0.0)                    # ReLU after every block
            h = z if l == n_layers - 1 else z.astype(compute_dtype)
        o_ref[...] = h.astype(o_ref.dtype)

    return kernel


# --------------------------------------------------------------------------
# Parameter preparation (runs once, OUTSIDE the jitted hot path)
# --------------------------------------------------------------------------
def prepare_mlp_params(params, compute_dtype=jnp.float32):
    """Pad hidden dims to multiples of 128 and cast to the compute dtype.

    Returns (padded_params, dims) where dims are the real (unpadded) feature
    sizes [in_dim, h1, ..., out_dim].  First/last dims are left natural; only
    hidden dims are lane-padded (they never touch HBM as activations).
    Padded lanes stay exactly 0 through every layer (zero weight rows/cols +
    zero bias + relu(0) == 0).
    """
    n = len(params)
    dims = [params[0][0].shape[0]] + [w.shape[1] for w, _ in params]
    pdims = list(dims)
    for l in range(1, n):                      # hidden dims only
        pdims[l] = _round_up(dims[l], _LANE)

    padded = []
    for l, (w, b) in enumerate(params):
        ip, op = pdims[l], pdims[l + 1]
        w_p = jnp.pad(w.astype(compute_dtype),
                      ((0, ip - w.shape[0]), (0, op - w.shape[1])))
        b_p = jnp.pad(b.astype(compute_dtype), (0, op - b.shape[0])).reshape(1, op)
        padded.append((w_p, b_p))
    return padded, tuple(dims)


# --------------------------------------------------------------------------
# Forward pass
# --------------------------------------------------------------------------
def mlp_forward_pallas(x, padded_params, *, dims, batch_tile=1024,
                       out_dtype=None, min_pallas_batch=256):
    """Fused forward pass through all LinearBlocks in a single pallas_call."""
    batch, in_dim = x.shape
    n_layers = len(padded_params)
    cdtype = padded_params[0][0].dtype
    out_dtype = x.dtype if out_dtype is None else jnp.dtype(out_dtype)
    pdims = [padded_params[0][0].shape[0]] + [w.shape[1] for w, _ in padded_params]
    out_dim = pdims[-1]

    # ---- Small-batch fallback: XLA's fused chain beats pad+pallas+slice. ----
    if batch < min_pallas_batch:
        h = x.astype(cdtype)
        for l, (w, b) in enumerate(padded_params):
            z = jnp.dot(h, w, preferred_element_type=jnp.float32)
            z = jnp.maximum(z + b.astype(jnp.float32), 0.0)
            h = z if l == n_layers - 1 else z.astype(cdtype)
        return h.astype(out_dtype)

    # ---- Batch tiling: big tiles; >=2 tiles so v7x can use both TCs. -------
    batch_p = _round_up(batch, _SUBLANE)
    n_tiles = max(1, _cdiv(batch_p, batch_tile))
    if n_tiles == 1 and batch_p >= 128:
        n_tiles = 2
    tb = _round_up(_cdiv(batch_p, n_tiles), _SUBLANE)
    batch_p = tb * n_tiles

    x_p = x if batch_p == batch else jnp.pad(x, ((0, batch_p - batch), (0, 0)))

    # ---- Specs: x/out pipelined over the batch grid, weights VMEM-resident. -
    in_specs = [pl.BlockSpec((tb, pdims[0]), lambda i: (i, 0))]
    wb_flat = []
    for l, (w_p, b_p) in enumerate(padded_params):
        ip, op = pdims[l], pdims[l + 1]
        wb_flat += [w_p, b_p]
        in_specs += [
            pl.BlockSpec((ip, op), lambda i: (0, 0),
                         pipeline_mode=pl.Buffered(1)),   # constant index -> 1 buffer
            pl.BlockSpec((1, op), lambda i: (0, 0),
                         pipeline_mode=pl.Buffered(1)),
        ]
    out_specs = pl.BlockSpec((tb, out_dim), lambda i: (i, 0))

    # ---- Real VMEM footprint (+25% margin); never request 32-64 MiB. -------
    it_x = jnp.dtype(x.dtype).itemsize
    it_o = jnp.dtype(out_dtype).itemsize
    w_bytes = sum(int(a.size) * jnp.dtype(a.dtype).itemsize for a in wb_flat)
    act_bytes = 2 * tb * (pdims[0] * it_x + out_dim * it_o)        # dbl-buffered tiles
    inter_bytes = tb * sum(pdims[1:]) * 4                          # f32 intermediates
    vmem_bytes = int(1.25 * (act_bytes + w_bytes + inter_bytes))
    vmem_bytes = min(max(vmem_bytes, 8 * 1024 * 1024), 40 * 1024 * 1024)

    # ---- Cost estimate from real dims / actually transferred bytes. --------
    flops = 2 * batch * sum(dims[l] * dims[l + 1] for l in range(n_layers))
    bytes_accessed = (int(x_p.size) * it_x + w_bytes + batch_p * out_dim * it_o)

    out_p = pl.pallas_call(
        _make_fused_mlp_kernel(n_layers, cdtype),
        out_shape=jax.ShapeDtypeStruct((batch_p, out_dim), out_dtype),
        grid_spec=pl.GridSpec(
            grid=(n_tiles,),
            in_specs=in_specs,
            out_specs=out_specs,
        ),
        compiler_params=pltpu.CompilerParams(
            dimension_semantics=("parallel",),
            vmem_limit_bytes=int(vmem_bytes)),
        cost_estimate=pl.CostEstimate(
            flops=int(flops),
            transcendentals=0,
            bytes_accessed=int(bytes_accessed)),
    )(x_p, *wb_flat)

    return out_p if batch_p == batch else out_p[:batch]


mlp_forward = jax.jit(
    mlp_forward_pallas,
    static_argnames=("dims", "batch_tile", "out_dtype", "min_pallas_batch"))


# --------------------------------------------------------------------------
# Init + reference
# --------------------------------------------------------------------------
def init_mlp_params(key, input_size, hidden_sizes, output_size,
                    dtype=jnp.float32):
    """Matches PyTorch MLP init: weights xavier_uniform_, biases default
    nn.Linear init U(-1/sqrt(fan_in), +1/sqrt(fan_in)).  Weights stored
    pre-transposed as (in_dim, out_dim)."""
    sizes = [input_size] + list(hidden_sizes) + [output_size]
    params = []
    for i in range(len(sizes) - 1):
        fan_in, fan_out = sizes[i], sizes[i + 1]
        key, kw, kb = jax.random.split(key, 3)
        bound_w = (6.0 / (fan_in + fan_out)) ** 0.5
        w = jax.random.uniform(kw, (fan_in, fan_out), dtype,
                               minval=-bound_w, maxval=bound_w)
        bound_b = 1.0 / (fan_in ** 0.5)
        b = jax.random.uniform(kb, (fan_out,), dtype,
                               minval=-bound_b, maxval=bound_b)
        params.append((w, b))
    return params


def mlp_forward_ref(x, params):
    """Pure-JAX reference (ReLU after every block, per the PyTorch spec)."""
    for w, b in params:
        x = jnp.maximum(x @ w + b, 0.0)
    return x


# --------------------------------------------------------------------------
# Test
# --------------------------------------------------------------------------
if __name__ == "__main__":
    key = jax.random.PRNGKey(0)
    kx, kp = jax.random.split(key)

    input_size, hidden_sizes, output_size = 32, [64, 48], 16
    params = init_mlp_params(kp, input_size, hidden_sizes, output_size)

    # --- Pallas path, f32 compute; batch big enough for a 2-tile grid. ------
    batch = 1024
    x = jax.random.normal(kx, (batch, input_size), jnp.float32)
    padded_f32, dims = prepare_mlp_params(params, jnp.float32)

    out = mlp_forward(x, padded_f32, dims=dims, batch_tile=512)
    out = jax.block_until_ready(out)
    ref = mlp_forward_ref(x, params)
    assert out.shape == (batch, output_size)
    assert jnp.allclose(out, ref, atol=1e-5, rtol=1e-5), "f32 kernel mismatch"

    # --- Pallas path, bf16 compute (halves weight bytes, native MXU rate). --
    padded_bf16, _ = prepare_mlp_params(params, jnp.bfloat16)
    out_bf16 = jax.block_until_ready(
        mlp_forward(x, padded_bf16, dims=dims, batch_tile=512))
    assert out_bf16.shape == (batch, output_size)
    assert jnp.allclose(out_bf16, ref, atol=1e-1, rtol=5e-2), "bf16 kernel mismatch"

    # --- Small-batch fallback path (pure-JAX chain). ------------------------
    x_small = x[:8]
    out_small = jax.block_until_ready(
        mlp_forward(x_small, padded_f32, dims=dims))
    ref_small = mlp_forward_ref(x_small, params)
    assert out_small.shape == (8, output_size)
    assert jnp.allclose(out_small, ref_small, atol=1e-5, rtol=1e-5), \
        "fallback mismatch"

    print("KERNEL_OK")
</pallas_src>

<mosaic_0001>
module attributes {stable_mosaic.version = 11 : i64} {
  func.func @kernel(%arg0: i32, %arg1: memref<512x32xf32, #tpu.memory_space<vmem>>, %arg2: memref<32x128xf32, #tpu.memory_space<vmem>>, %arg3: memref<1x128xf32, #tpu.memory_space<vmem>>, %arg4: memref<128x128xf32, #tpu.memory_space<vmem>>, %arg5: memref<1x128xf32, #tpu.memory_space<vmem>>, %arg6: memref<128x16xf32, #tpu.memory_space<vmem>>, %arg7: memref<1x16xf32, #tpu.memory_space<vmem>>, %arg8: memref<512x16xf32, #tpu.memory_space<vmem>>) attributes {dimension_semantics = [#tpu.dimension_semantics<parallel>], iteration_bounds = array<i64: 2>, scalar_prefetch = 0 : i64, scratch_operands = 0 : i64, tpu.core_type = #tpu.core_type<tc>, window_params = [{transform_indices = @transform_0, window_bounds = array<i64: 512, 32>}, {pipeline_mode = #tpu.pipeline_mode<synchronous>, transform_indices = @transform_1, window_bounds = array<i64: 32, 128>}, {pipeline_mode = #tpu.pipeline_mode<synchronous>, transform_indices = @transform_2, window_bounds = array<i64: 1, 128>}, {pipeline_mode = #tpu.pipeline_mode<synchronous>, transform_indices = @transform_3, window_bounds = array<i64: 128, 128>}, {pipeline_mode = #tpu.pipeline_mode<synchronous>, transform_indices = @transform_4, window_bounds = array<i64: 1, 128>}, {pipeline_mode = #tpu.pipeline_mode<synchronous>, transform_indices = @transform_5, window_bounds = array<i64: 128, 16>}, {pipeline_mode = #tpu.pipeline_mode<synchronous>, transform_indices = @transform_6, window_bounds = array<i64: 1, 16>}, {transform_indices = @transform_7, window_bounds = array<i64: 512, 16>}]} {
    %c0 = arith.constant 0 : index
    %c0_0 = arith.constant 0 : index
    %0 = vector.load %arg1[%c0, %c0_0] : memref<512x32xf32, #tpu.memory_space<vmem>>, vector<512x32xf32>
    %c0_1 = arith.constant 0 : index
    %c0_2 = arith.constant 0 : index
    %1 = vector.load %arg2[%c0_1, %c0_2] : memref<32x128xf32, #tpu.memory_space<vmem>>, vector<32x128xf32>
    %c0_3 = arith.constant 0 : index
    %c0_4 = arith.constant 0 : index
    %2 = vector.load %arg3[%c0_3, %c0_4] : memref<1x128xf32, #tpu.memory_space<vmem>>, vector<1x128xf32>
    %cst = arith.constant dense<0.000000e+00> : vector<512x128xf32>
    %3 = tpu.matmul %0, %1, %cst {dimension_numbers = #tpu.dot_dimension_numbers<[1], [0], [0], [1], [0, 0, 1, 1], [], []>} : vector<512x32xf32>, vector<32x128xf32>, vector<512x128xf32> -> vector<512x128xf32>
    %4 = vector.broadcast %2 : vector<1x128xf32> to vector<512x128xf32>
    %5 = arith.addf %3, %4 : vector<512x128xf32>
    %cst_5 = arith.constant 0.000000e+00 : f32
    %6 = vector.broadcast %cst_5 : f32 to vector<512x128xf32>
    %7 = arith.maximumf %5, %6 : vector<512x128xf32>
    %c0_6 = arith.constant 0 : index
    %c0_7 = arith.constant 0 : index
    %8 = vector.load %arg4[%c0_6, %c0_7] : memref<128x128xf32, #tpu.memory_space<vmem>>, vector<128x128xf32>
    %c0_8 = arith.constant 0 : index
    %c0_9 = arith.constant 0 : index
    %9 = vector.load %arg5[%c0_8, %c0_9] : memref<1x128xf32, #tpu.memory_space<vmem>>, vector<1x128xf32>
    %cst_10 = arith.constant dense<0.000000e+00> : vector<512x128xf32>
    %10 = tpu.matmul %7, %8, %cst_10 {dimension_numbers = #tpu.dot_dimension_numbers<[1], [0], [0], [1], [0, 0, 1, 1], [], []>} : vector<512x128xf32>, vector<128x128xf32>, vector<512x128xf32> -> vector<512x128xf32>
    %11 = vector.broadcast %9 : vector<1x128xf32> to vector<512x128xf32>
    %12 = arith.addf %10, %11 : vector<512x128xf32>
    %cst_11 = arith.constant 0.000000e+00 : f32
    %13 = vector.broadcast %cst_11 : f32 to vector<512x128xf32>
    %14 = arith.maximumf %12, %13 : vector<512x128xf32>
    %c0_12 = arith.constant 0 : index
    %c0_13 = arith.constant 0 : index
    %15 = vector.load %arg6[%c0_12, %c0_13] : memref<128x16xf32, #tpu.memory_space<vmem>>, vector<128x16xf32>
    %c0_14 = arith.constant 0 : index
    %c0_15 = arith.constant 0 : index
    %16 = vector.load %arg7[%c0_14, %c0_15] : memref<1x16xf32, #tpu.memory_space<vmem>>, vector<1x16xf32>
    %cst_16 = arith.constant dense<0.000000e+00> : vector<512x16xf32>
    %17 = tpu.matmul %14, %15, %cst_16 {dimension_numbers = #tpu.dot_dimension_numbers<[1], [0], [0], [1], [0, 0, 1, 1], [], []>} : vector<512x128xf32>, vector<128x16xf32>, vector<512x16xf32> -> vector<512x16xf32>
    %18 = vector.broadcast %16 : vector<1x16xf32> to vector<512x16xf32>
    %19 = arith.addf %17, %18 : vector<512x16xf32>
    %cst_17 = arith.constant 0.000000e+00 : f32
    %20 = vector.broadcast %cst_17 : f32 to vector<512x16xf32>
    %21 = arith.maximumf %19, %20 : vector<512x16xf32>
    %c0_18 = arith.constant 0 : index
    %c0_19 = arith.constant 0 : index
    %22 = vector.load %arg8[%c0_18, %c0_19] : memref<512x16xf32, #tpu.memory_space<vmem>>, vector<512x16xf32>
    tpu.vector_store %arg8[%c0_18, %c0_19], %21 {strides = array<i32>} : memref<512x16xf32, #tpu.memory_space<vmem>>, vector<512x16xf32>,
    return
  }
  func.func @transform_0(%arg0: i32) -> (i32, i32) {
    %c0_i32 = arith.constant 0 : i32
    %c0_i32_0 = arith.constant 0 : i32
    return %arg0, %c0_i32 : i32, i32
  }
  func.func @transform_1(%arg0: i32) -> (i32, i32) {
    %c0_i32 = arith.constant 0 : i32
    %c0_i32_0 = arith.constant 0 : i32
    %c0_i32_1 = arith.constant 0 : i32
    return %c0_i32, %c0_i32_0 : i32, i32
  }
  func.func @transform_2(%arg0: i32) -> (i32, i32) {
    %c0_i32 = arith.constant 0 : i32
    %c0_i32_0 = arith.constant 0 : i32
    %c0_i32_1 = arith.constant 0 : i32
    return %c0_i32, %c0_i32_0 : i32, i32
  }
  func.func @transform_3(%arg0: i32) -> (i32, i32) {
    %c0_i32 = arith.constant 0 : i32
    %c0_i32_0 = arith.constant 0 : i32
    %c0_i32_1 = arith.constant 0 : i32
    return %c0_i32, %c0_i32_0 : i32, i32
  }
  func.func @transform_4(%arg0: i32) -> (i32, i32) {
    %c0_i32 = arith.constant 0 : i32
    %c0_i32_0 = arith.constant 0 : i32
    %c0_i32_1 = arith.constant 0 : i32
    return %c0_i32, %c0_i32_0 : i32, i32
  }
  func.func @transform_5(%arg0: i32) -> (i32, i32) {
    %c0_i32 = arith.constant 0 : i32
    %c0_i32_0 = arith.constant 0 : i32
    %c0_i32_1 = arith.constant 0 : i32
    return %c0_i32, %c0_i32_0 : i32, i32
  }
  func.func @transform_6(%arg0: i32) -> (i32, i32) {
    %c0_i32 = arith.constant 0 : i32
    %c0_i32_0 = arith.constant 0 : i32
    %c0_i32_1 = arith.constant 0 : i32
    return %c0_i32, %c0_i32_0 : i32, i32
  }
  func.func @transform_7(%arg0: i32) -> (i32, i32) {
    %c0_i32 = arith.constant 0 : i32
    %c0_i32_0 = arith.constant 0 : i32
    return %arg0, %c0_i32 : i32, i32
  }
}

</mosaic_0001>

<bundles_post_ra>
// kernel: mlp_forward_pallas.1
= control target key start
LH: loop header
LB: loop body
LE: loop exit
PB: predicated region body
PF: predicated region fallthrough
CT: control target
= control target key end

     0   :  { %s1700_s24 = smov 0   ;;  %s2378_s0 = inlined_call_operand.vmem [shape: f32[1024,32], index: 0, kind: input, shape index: {}]   ;;  %s2379_s1 = inlined_call_operand.vmem [shape: f32[32,128], index: 1, kind: input, shape index: {}]   ;;  %s2380_s2 = inlined_call_operand.vmem [shape: f32[1,128], index: 2, kind: input, shape index: {}]   ;;  %s2381_s3 = inlined_call_operand.vmem [shape: f32[128,128], index: 3, kind: input, shape index: {}]   ;;  %s2382_s4 = inlined_call_operand.vmem [shape: f32[1,128], index: 4, kind: input, shape index: {}]   ;;  %s2383_s5 = inlined_call_operand.vmem [shape: f32[128,16], index: 5, kind: input, shape index: {}]   ;;  %s2384_s6 = inlined_call_operand.vmem [shape: f32[1,16], index: 6, kind: input, shape index: {}]   ;;  %s2385_s7 = inlined_call_operand.vmem [shape: f32[1024,16], index: 7, kind: output, shape index: {}]  }
   0x1 LB: > { %s1527_s25 = sadd.s32 4294967295, %s1658_s24   ;;  %p1531_p0 = scmp.ge.s32.totalorder %s1658_s24, 1  ;;  %s1658_s24 = sphi %s1700_s24, %s17_s24  }
   0x2   : > { %p238_p1 = scmp.lt.s32.totalorder %s1658_s24, 3 }
   0x4   : > { %p239_p2 = pnand %p1531_p0, %p238_p1 }
   0x5   : > { %s1532_s30 = sshll.u32 (!%p239_p2), %s1527_s25, 6 }
   0x6   : > { %242 = sbr.rel (%p239_p2) target bundleno = 926 (0x39e), region = 48  ;;  %p271_p3 = scmp.lt.s32.totalorder (!%p239_p2), %s1532_s30, 127 }
   0xb   : > { %v349_v0 = vld [vmem:[%s2379_s1 + $0x18] sm:$0xff]  ;;  %v348_v1 = vld [vmem:[%s2379_s1 + $0x10] sm:$0xff]  ;;  %v347_v2 = vld [vmem:[%s2379_s1 + $0x8] sm:$0xff]  ;;  %s2387_s30 = smov (!%p271_p3, %s1532_s30), 127  ;;  %vm354_vm0 = vcmask 261120   ;;  %vm1406_vm1 = vcmask 130048  }
   0xc   : > { %559 = vmatpush.msra.mxu0 %v349_v0  ;;  %1602 = vmatpush.msra.mxu3 %v349_v0  ;;  %v346_v3 = vld [vmem:[%s2379_s1] sm:$0xff]  ;;  %s1533_s12 = sshll.u32 %s2387_s30, 3  ;;  %v835_v13 = vld [vmem:[%s2381_s3 + $0x78] sm:$0xff]  ;;  %v834_v14 = vld [vmem:[%s2381_s3 + $0x70] sm:$0xff] }
   0xd   : > { %s1728_s15 = scalar_lea.vmem %s2378_s0, %s1533_s12  ;;  %840 = vmatpush.msra.mxu1 %v835_v13  ;;  %v833_v15 = vld [vmem:[%s2381_s3 + $0x68] sm:$0xff]  ;;  %v832_v17 = vld [vmem:[%s2381_s3 + $0x60] sm:$0xff]  ;;  %v831_v18 = vld [vmem:[%s2381_s3 + $0x58] sm:$0xff]  ;;  %s2070_s10 = scalar_lea.vmem %s2385_s7, %s1533_s12 }
   0xe   : > { %560 = vmatpush.msra.mxu0 %v348_v1  ;;  %1603 = vmatpush.msra.mxu3 %v348_v1  ;;  %v282_v4 = vld [vmem:[%s1728_s15] sm:$0xff]  ;;  %v283_v5 = vld [vmem:[%s1728_s15 + $0x8] sm:$0xff]  ;;  %v284_v6 = vld [vmem:[%s1728_s15 + $0x10] sm:$0xff] }
   0xf   : > { %v285_v7 = vld [vmem:[%s1728_s15 + $0x18] sm:$0xff]  ;;  %v286_v8 = vld [vmem:[%s1728_s15 + $0x20] sm:$0xff]  ;;  %v287_v9 = vld [vmem:[%s1728_s15 + $0x28] sm:$0xff]  ;;  %841 = vmatpush.msra.mxu1 %v834_v14 }
  0x10   : > { %561 = vmatpush.msra.mxu0 %v347_v2  ;;  %1604 = vmatpush.msra.mxu3 %v347_v2  ;;  %v288_v10 = vld [vmem:[%s1728_s15 + $0x30] sm:$0xff]  ;;  %v289_v11 = vld [vmem:[%s1728_s15 + $0x38] sm:$0xff]  ;;  %v290_v12 = vld [vmem:[%s1728_s15 + $0x40] sm:$0xff] }
  0x11   : > { %v291_v16 = vld [vmem:[%s1728_s15 + $0x48] sm:$0xff]  ;;  %842 = vmatpush.msra.mxu1 %v833_v15  ;;  %v830_v19 = vld [vmem:[%s2381_s3 + $0x50] sm:$0xff]  ;;  %v828_v22 = vld [vmem:[%s2381_s3 + $0x40] sm:$0xff] }
  0x12   : > { %562 = vmatpush.msra.mxu0 %v346_v3  ;;  %1605 = vmatpush.msra.mxu3 %v346_v3  ;;  %v829_v20 = vld [vmem:[%s2381_s3 + $0x48] sm:$0xff]  ;;  %v292_v21 = vld [vmem:[%s1728_s15 + $0x50] sm:$0xff]  ;;  %v827_v23 = vld [vmem:[%s2381_s3 + $0x38] sm:$0xff] }
  0x13   : > { %1536 = vmatmul.msk.f32.vlgmr.msra.gmra.mxu0 %vm354_vm0, %v282_v4  ;;  %843 = vmatpush.msra.mxu1 %v832_v17  ;;  %v826_v24 = vld [vmem:[%s2381_s3 + $0x30] sm:$0xff]  ;;  %v825_v25 = vld [vmem:[%s2381_s3 + $0x28] sm:$0xff]  ;;  %v293_v26 = vld [vmem:[%s1728_s15 + $0x58] sm:$0xff] }
  0x14   : > { %1606 = vmatpush.msrb.mxu3 %v835_v13  ;;  %v824_v27 = vld [vmem:[%s2381_s3 + $0x20] sm:$0xff]  ;;  %v823_v28 = vld [vmem:[%s2381_s3 + $0x18] sm:$0xff]  ;;  %v822_v29 = vld [vmem:[%s2381_s3 + $0x10] sm:$0xff] }
  0x15   : > { %844 = vmatpush.msra.mxu1 %v831_v18  ;;  %v294_v30 = vld [vmem:[%s1728_s15 + $0x60] sm:$0xff]  ;;  %v821_v31 = vld [vmem:[%s2381_s3 + $0x8] sm:$0xff]  ;;  %v296_v34 = vld [vmem:[%s1728_s15 + $0x70] sm:$0xff] }
  0x16   : > { %1607 = vmatpush.msrb.mxu3 %v834_v14  ;;  %v820_v32 = vld [vmem:[%s2381_s3] sm:$0xff]  ;;  %v295_v33 = vld [vmem:[%s1728_s15 + $0x68] sm:$0xff]  ;;  %v297_v35 = vld [vmem:[%s1728_s15 + $0x78] sm:$0xff] }
  0x17   : > { %845 = vmatpush.msra.mxu1 %v830_v19  ;;  %v1813_v36 = vld [vmem:[%s2380_s2] ss:$0 sm:$0xff]  ;;  %v299_v42 = vld [vmem:[%s1728_s15 + $0x88] sm:$0xff]  ;;  %v300_v46 = vld [vmem:[%s1728_s15 + $0x90] sm:$0xff] }
  0x18   : > { %1608 = vmatpush.msrb.mxu3 %v833_v15  ;;  %v298_v38 = vld [vmem:[%s1728_s15 + $0x80] sm:$0xff]  ;;  %v301_v50 = vld [vmem:[%s1728_s15 + $0x98] sm:$0xff]  ;;  %v303_v58 = vld [vmem:[%s1728_s15 + $0xa8] sm:$0xff] }
  0x19   : > { %846 = vmatpush.msra.mxu1 %v829_v20  ;;  %v302_v54 = vld [vmem:[%s1728_s15 + $0xa0] sm:$0xff]  ;;  %v304_v62 = vld [vmem:[%s1728_s15 + $0xb0] sm:$0xff]  ;;  %v305_v2 = vld [vmem:[%s1728_s15 + $0xb8] sm:$0xff] }
  0x1a   : > { %1609 = vmatpush.msrb.mxu3 %v832_v17  ;;  %v1853_v13 = vld [vmem:[%s2383_s5 + $0x70] sm:$0xff]  ;;  %v1860_v15 = vld [vmem:[%s2383_s5 + $0x68] sm:$0xff]  ;;  %v1872_v17 = vld [vmem:[%s2383_s5 + $0x58] sm:$0xff] }
  0x1b   : > { %1537 = vmatmul.msk.f32.gmra.mxu0 %vm354_vm0, %v283_v5  ;;  %847 = vmatpush.msra.mxu1 %v828_v22 }
  0x1c   : > { %1610 = vmatpush.msrb.mxu3 %v831_v18 }
  0x1d   : > { %848 = vmatpush.msra.mxu1 %v827_v23 }
  0x1e   : > { %1611 = vmatpush.msrb.mxu3 %v830_v19  ;;  %v308_v19 = vld [vmem:[%s1728_s15 + $0xd0] sm:$0xff] }
  0x1f   : > { %849 = vmatpush.msra.mxu1 %v826_v24 }
  0x20   : > { %1612 = vmatpush.msrb.mxu3 %v829_v20 }
  0x21   : > { %850 = vmatpush.msra.mxu1 %v825_v25 }
  0x22   : > { %1613 = vmatpush.msrb.mxu3 %v828_v22 }
  0x23   : > { %1538 = vmatmul.msk.f32.gmra.mxu0 %vm354_vm0, %v284_v6  ;;  %851 = vmatpush.msra.mxu1 %v824_v27  ;;  %v306_v6 = vld [vmem:[%s1728_s15 + $0xc0] sm:$0xff] }
  0x24   : > { %1614 = vmatpush.msrb.mxu3 %v827_v23  ;;  %v1887_v23 = vld [vmem:[%s2383_s5 + $0x48] sm:$0xff] }
  0x25   : > { %852 = vmatpush.msra.mxu1 %v823_v28 }
  0x26   : > { %1615 = vmatpush.msrb.mxu3 %v826_v24  ;;  %v1893_v24 = vld [vmem:[%s2383_s5 + $0x40] sm:$0xff] }
  0x27   : > { %853 = vmatpush.msra.mxu1 %v822_v29 }
  0x28   : > { %1616 = vmatpush.msrb.mxu3 %v825_v25  ;;  %v1899_v25 = vld [vmem:[%s2383_s5 + $0x38] sm:$0xff] }
  0x29   : > { %854 = vmatpush.msra.mxu1 %v821_v31 }
  0x2a   : > { %1617 = vmatpush.msrb.mxu3 %v824_v27  ;;  %v309_v27 = vld [vmem:[%s1728_s15 + $0xd8] sm:$0xff] }
  0x2b   : > { %1539 = vmatmul.msk.f32.gmra.mxu0 %vm354_vm0, %v285_v7  ;;  %855 = vmatpush.msra.mxu1 %v820_v32 }
  0x2c   : > { %1618 = vmatpush.msrb.mxu3 %v823_v28 }
  0x2e   : > { %1619 = vmatpush.msrb.mxu3 %v822_v29  ;;  %v1907_v29 = vld [vmem:[%s2383_s5 + $0x30] sm:$0xff] }
  0x30   : > { %1620 = vmatpush.msrb.mxu3 %v821_v31  ;;  %v1914_v31 = vld [vmem:[%s2383_s5 + $0x28] sm:$0xff] }
  0x32   : > { %1621 = vmatpush.msrb.mxu3 %v820_v32  ;;  %v1920_v32 = vld [vmem:[%s2383_s5 + $0x20] sm:$0xff] }
  0x33   : > { %1540 = vmatmul.msk.f32.gmra.mxu0 %vm354_vm0, %v286_v8 }
  0x3b   : > { %1541 = vmatmul.msk.f32.gmra.mxu0 %vm354_vm0, %v287_v9  ;;  %v1845_v9 = vld [vmem:[%s2383_s5 + $0x78] sm:$0xff] }
  0x3c   : > { %1133 = vmatpush.msra.mxu2 %v1845_v9 }
  0x3e   : > { %1134 = vmatpush.msra.mxu2 %v1853_v13 }
  0x40   : > { %1135 = vmatpush.msra.mxu2 %v1860_v15 }
  0x43   : > { %1542 = vmatmul.msk.f32.gmra.mxu0 %vm354_vm0, %v288_v10 }
  0x4b   : > { %1543 = vmatmul.msk.f32.gmra.mxu0 %vm354_vm0, %v289_v11  ;;  %v307_v11 = vld [vmem:[%s1728_s15 + $0xc8] sm:$0xff] }
  0x53   : > { %1544 = vmatmul.msk.f32.gmra.mxu0 %vm354_vm0, %v290_v12 }
  0x5b   : > { %1545 = vmatmul.msk.f32.gmra.mxu0 %vm354_vm0, %v291_v16  ;;  %v1866_v16 = vld [vmem:[%s2383_s5 + $0x60] sm:$0xff] }
  0x5c   : > { %1136 = vmatpush.msra.mxu2 %v1866_v16 }
  0x5e   : > { %1137 = vmatpush.msra.mxu2 %v1872_v17 }
  0x63   : > { %1546 = vmatmul.msk.f32.gmra.mxu0 %vm354_vm0, %v292_v21  ;;  %v1880_v21 = vld [vmem:[%s2383_s5 + $0x50] sm:$0xff] }
  0x64   : > { %1138 = vmatpush.msra.mxu2 %v1880_v21 }
  0x66   : > { %1139 = vmatpush.msra.mxu2 %v1887_v23 }
  0x68   : > { %1140 = vmatpush.msra.mxu2 %v1893_v24 }
  0x6a   : > { %1141 = vmatpush.msra.mxu2 %v1899_v25 }
  0x6b   : > { %1547 = vmatmul.msk.f32.gmra.mxu0 %vm354_vm0, %v293_v26 }
  0x6c   : > { %1142 = vmatpush.msra.mxu2 %v1907_v29 }
  0x6e   : > { %1143 = vmatpush.msra.mxu2 %v1914_v31 }
  0x70   : > { %1144 = vmatpush.msra.mxu2 %v1920_v32 }
  0x73   : > { %1548 = vmatmul.msk.f32.gmra.mxu0 %vm354_vm0, %v294_v30 }
  0x7b   : > { %1549 = vmatmul.msk.f32.gmra.mxu0 %vm354_vm0, %v295_v33  ;;  %v1926_v33 = vld [vmem:[%s2383_s5 + $0x18] sm:$0xff] }
  0x7c   : > { %1145 = vmatpush.msra.mxu2 %v1926_v33 }
  0x83   : > { %1550 = vmatmul.msk.f32.gmra.mxu0 %vm354_vm0, %v296_v34 }
  0x8b   : > { %1551 = vmatmul.msk.f32.gmra.mxu0 %vm354_vm0, %v297_v35  ;;  %v310_v35 = vld [vmem:[%s1728_s15 + $0xe0] sm:$0xff] }
  0x90   : > { %v564_v37 = vpop.f32.mrf.mxu0 }
  0x91   : > { %v565_v39 = vadd.f32 %v1813_v36, %v564_v37 }
  0x93   : > { %1552 = vmatmul.msk.f32.gmra.mxu0 %vm354_vm0, %v298_v38  ;;  %v756_v40 = vmax.f32 %v565_v39, 0.0  ;;  %v1934_v38 = vld [vmem:[%s2383_s5 + $0x10] sm:$0xff] }
  0x94   : > { %1146 = vmatpush.msra.mxu2 %v1934_v38 }
  0x95   : > { %856 = vmatmul.f32.vlgmr.msra.gmra.mxu1 %v756_v40  ;;  %v1941_v40 = vld [vmem:[%s2383_s5 + $0x8] sm:$0xff] }
  0x96   : > { %1147 = vmatpush.msra.mxu2 %v1941_v40 }
  0x98   : > { %v567_v41 = vpop.f32.mrf.mxu0 }
  0x99   : > { %v568_v43 = vadd.f32 %v1813_v36, %v567_v41  ;;  %v1947_v41 = vld [vmem:[%s2383_s5] sm:$0xff] }
  0x9a   : > { %1148 = vmatpush.msra.mxu2 %v1947_v41 }
  0x9b   : > { %1553 = vmatmul.msk.f32.gmra.mxu0 %vm354_vm0, %v299_v42  ;;  %v757_v44 = vmax.f32 %v568_v43, 0.0  ;;  %v311_v43 = vld [vmem:[%s1728_s15 + $0xe8] sm:$0xff] }
  0x9d   : > { %859 = vmatmul.f32.gmra.mxu1 %v757_v44 }
  0xa0   : > { %v570_v45 = vpop.f32.mrf.mxu0 }
  0xa1   : > { %v571_v47 = vadd.f32 %v1813_v36, %v570_v45 }
  0xa3   : > { %1554 = vmatmul.msk.f32.gmra.mxu0 %vm354_vm0, %v300_v46  ;;  %v758_v48 = vmax.f32 %v571_v47, 0.0  ;;  %v312_v47 = vld [vmem:[%s1728_s15 + $0xf0] sm:$0xff] }
  0xa5   : > { %862 = vmatmul.f32.gmra.mxu1 %v758_v48 }
  0xa8   : > { %v573_v49 = vpop.f32.mrf.mxu0 }
  0xa9   : > { %v574_v51 = vadd.f32 %v1813_v36, %v573_v49 }
  0xab   : > { %1555 = vmatmul.msk.f32.gmra.mxu0 %vm354_vm0, %v301_v50  ;;  %v759_v52 = vmax.f32 %v574_v51, 0.0  ;;  %v313_v51 = vld [vmem:[%s1728_s15 + $0xf8] sm:$0xff] }
  0xad   : > { %865 = vmatmul.f32.gmra.mxu1 %v759_v52 }
  0xb0   : > { %v576_v53 = vpop.f32.mrf.mxu0 }
  0xb1   : > { %v577_v55 = vadd.f32 %v1813_v36, %v576_v53 }
  0xb3   : > { %1556 = vmatmul.msk.f32.gmra.mxu0 %vm354_vm0, %v302_v54  ;;  %v760_v56 = vmax.f32 %v577_v55, 0.0  ;;  %v1962_v54 = vld [vmem:[%s2382_s4] ss:$0 sm:$0xff] }
  0xb5   : > { %868 = vmatmul.f32.gmra.mxu1 %v760_v56  ;;  %v314_v56 = vld [vmem:[%s1728_s15 + $0x100] sm:$0xff] }
  0xb8   : > { %v579_v57 = vpop.f32.mrf.mxu0 }
  0xb9   : > { %v580_v59 = vadd.f32 %v1813_v36, %v579_v57 }
  0xbb   : > { %1557 = vmatmul.msk.f32.gmra.mxu0 %vm354_vm0, %v303_v58  ;;  %v761_v60 = vmax.f32 %v580_v59, 0.0 }
  0xbd   : > { %871 = vmatmul.f32.gmra.mxu1 %v761_v60 }
  0xc0   : > { %v582_v61 = vpop.f32.mrf.mxu0 }
  0xc1   : > { %v583_v63 = vadd.f32 %v1813_v36, %v582_v61 }
  0xc3   : > { %1558 = vmatmul.msk.f32.gmra.mxu0 %vm354_vm0, %v304_v62  ;;  %v762_v0 = vmax.f32 %v583_v63, 0.0  ;;  %v315_v63 = vld [vmem:[%s1728_s15 + $0x108] sm:$0xff] }
  0xc5   : > { %874 = vmatmul.f32.gmra.mxu1 %v762_v0 }
  0xc8   : > { %v585_v1 = vpop.f32.mrf.mxu0 }
  0xc9   : > { %v586_v3 = vadd.f32 %v1813_v36, %v585_v1 }
  0xcb   : > { %1559 = vmatmul.msk.f32.gmra.mxu0 %vm354_vm0, %v305_v2  ;;  %v763_v4 = vmax.f32 %v586_v3, 0.0 }
  0xcd   : > { %877 = vmatmul.f32.gmra.mxu1 %v763_v4 }
  0xd0   : > { %v588_v5 = vpop.f32.mrf.mxu0 }
  0xd1   : > { %v589_v7 = vadd.f32 %v1813_v36, %v588_v5 }
  0xd3   : > { %1560 = vmatmul.msk.f32.gmra.mxu0 %vm354_vm0, %v306_v6  ;;  %v764_v8 = vmax.f32 %v589_v7, 0.0  ;;  %v316_v6 = vld [vmem:[%s1728_s15 + $0x110] sm:$0xff] }
  0xd5   : > { %880 = vmatmul.f32.gmra.mxu1 %v764_v8 }
  0xd8   : > { %v591_v10 = vpop.f32.mrf.mxu0 }
  0xd9   : > { %v592_v12 = vadd.f32 %v1813_v36, %v591_v10 }
  0xdb   : > { %1561 = vmatmul.msk.f32.gmra.mxu0 %vm354_vm0, %v307_v11  ;;  %v765_v14 = vmax.f32 %v592_v12, 0.0 }
  0xdd   : > { %883 = vmatmul.f32.gmra.mxu1 %v765_v14 }
  0xe0   : > { %v594_v18 = vpop.f32.mrf.mxu0 }
  0xe1   : > { %v595_v20 = vadd.f32 %v1813_v36, %v594_v18  ;;  %v317_v18 = vld [vmem:[%s1728_s15 + $0x118] sm:$0xff] }
  0xe3   : > { %1562 = vmatmul.msk.f32.gmra.mxu0 %vm354_vm0, %v308_v19  ;;  %v766_v22 = vmax.f32 %v595_v20, 0.0 }
  0xe5   : > { %886 = vmatmul.f32.gmra.mxu1 %v766_v22 }
  0xe8   : > { %v597_v26 = vpop.f32.mrf.mxu0 }
  0xe9   : > { %v598_v28 = vadd.f32 %v1813_v36, %v597_v26 }
  0xeb   : > { %1563 = vmatmul.msk.f32.gmra.mxu0 %vm354_vm0, %v309_v27  ;;  %v767_v30 = vmax.f32 %v598_v28, 0.0 }
  0xed   : > { %889 = vmatmul.f32.gmra.mxu1 %v767_v30  ;;  %v318_v30 = vld [vmem:[%s1728_s15 + $0x120] sm:$0xff] }
  0xf0   : > { %v600_v34 = vpop.f32.mrf.mxu0 }
  0xf1   : > { %v601_v37 = vadd.f32 %v1813_v36, %v600_v34 }
  0xf3   : > { %1564 = vmatmul.msk.f32.gmra.mxu0 %vm354_vm0, %v310_v35  ;;  %v768_v39 = vmax.f32 %v601_v37, 0.0 }
  0xf5   : > { %892 = vmatmul.f32.gmra.mxu1 %v768_v39 }
  0xf8   : > { %v603_v42 = vpop.f32.mrf.mxu0 }
  0xf9   : > { %v604_v44 = vadd.f32 %v1813_v36, %v603_v42 }
  0xfb   : > { %1565 = vmatmul.msk.f32.gmra.mxu0 %vm354_vm0, %v311_v43  ;;  %v769_v45 = vmax.f32 %v604_v44, 0.0  ;;  %v319_v44 = vld [vmem:[%s1728_s15 + $0x128] sm:$0xff] }
  0xfd   : > { %895 = vmatmul.f32.gmra.mxu1 %v769_v45 }
 0x100   : > { %v606_v46 = vpop.f32.mrf.mxu0 }
 0x101   : > { %v607_v48 = vadd.f32 %v1813_v36, %v606_v46 }
 0x103   : > { %1566 = vmatmul.msk.f32.gmra.mxu0 %vm354_vm0, %v312_v47  ;;  %v770_v49 = vmax.f32 %v607_v48, 0.0 }
 0x105   : > { %898 = vmatmul.f32.gmra.mxu1 %v770_v49 }
 0x108   : > { %v609_v50 = vpop.f32.mrf.mxu0 }
 0x109   : > { %v610_v52 = vadd.f32 %v1813_v36, %v609_v50 }
 0x10b   : > { %1567 = vmatmul.msk.f32.gmra.mxu0 %vm354_vm0, %v313_v51  ;;  %v771_v53 = vmax.f32 %v610_v52, 0.0  ;;  %v320_v51 = vld [vmem:[%s1728_s15 + $0x130] sm:$0xff] }
 0x10d   : > { %901 = vmatmul.f32.gmra.mxu1 %v771_v53 }
 0x110   : > { %v612_v55 = vpop.f32.mrf.mxu0 }
 0x111   : > { %v613_v57 = vadd.f32 %v1813_v36, %v612_v55 }
 0x112   : > { %v857_v58 = vpop.f32.mrf.mxu1 }
 0x113   : > { %v858_v59 = vadd.f32 %v1962_v54, %v857_v58  ;;  %1568 = vmatmul.msk.f32.gmra.mxu0 %vm354_vm0, %v314_v56  ;;  %v772_v60 = vmax.f32 %v613_v57, 0.0 }
 0x115   : > { %904 = vmatmul.f32.gmra.mxu1 %v772_v60  ;;  %v1049_v61 = vmax.f32 %v858_v59, 0.0  ;;  %v321_v59 = vld [vmem:[%s1728_s15 + $0x138] sm:$0xff] }
 0x117   : > { %1149 = vmatmul.f32.vlgmr.msra.gmra.mxu2 %v1049_v61 }
 0x118   : > { %v615_v62 = vpop.f32.mrf.mxu0 }
 0x119   : > { %v616_v0 = vadd.f32 %v1813_v36, %v615_v62 }
 0x11a   : > { %v860_v1 = vpop.f32.mrf.mxu1 }
 0x11b   : > { %v861_v2 = vadd.f32 %v1962_v54, %v860_v1  ;;  %1569 = vmatmul.msk.f32.gmra.mxu0 %vm354_vm0, %v315_v63  ;;  %v773_v3 = vmax.f32 %v616_v0, 0.0 }
 0x11d   : > { %907 = vmatmul.f32.gmra.mxu1 %v773_v3  ;;  %v1050_v4 = vmax.f32 %v861_v2, 0.0  ;;  %v322_v2 = vld [vmem:[%s1728_s15 + $0x140] sm:$0xff] }
 0x11f   : > { %1152 = vmatmul.f32.gmra.mxu2 %v1050_v4 }
 0x120   : > { %v618_v5 = vpop.f32.mrf.mxu0 }
 0x121   : > { %v619_v7 = vadd.f32 %v1813_v36, %v618_v5 }
 0x122   : > { %v863_v8 = vpop.f32.mrf.mxu1 }
 0x123   : > { %v864_v10 = vadd.f32 %v1962_v54, %v863_v8  ;;  %1570 = vmatmul.msk.f32.gmra.mxu0 %vm354_vm0, %v316_v6  ;;  %v774_v11 = vmax.f32 %v619_v7, 0.0 }
 0x125   : > { %910 = vmatmul.f32.gmra.mxu1 %v774_v11  ;;  %v1051_v12 = vmax.f32 %v864_v10, 0.0  ;;  %v323_v10 = vld [vmem:[%s1728_s15 + $0x148] sm:$0xff] }
 0x127   : > { %1155 = vmatmul.f32.gmra.mxu2 %v1051_v12 }
 0x128   : > { %v621_v14 = vpop.f32.mrf.mxu0 }
 0x129   : > { %v622_v19 = vadd.f32 %v1813_v36, %v621_v14 }
 0x12a   : > { %v866_v20 = vpop.f32.mrf.mxu1 }
 0x12b   : > { %v867_v22 = vadd.f32 %v1962_v54, %v866_v20  ;;  %1571 = vmatmul.msk.f32.gmra.mxu0 %vm354_vm0, %v317_v18  ;;  %v775_v26 = vmax.f32 %v622_v19, 0.0 }
 0x12d   : > { %913 = vmatmul.f32.gmra.mxu1 %v775_v26  ;;  %v1052_v27 = vmax.f32 %v867_v22, 0.0  ;;  %v324_v22 = vld [vmem:[%s1728_s15 + $0x150] sm:$0xff] }
 0x12f   : > { %1158 = vmatmul.f32.gmra.mxu2 %v1052_v27 }
 0x130   : > { %v624_v28 = vpop.f32.mrf.mxu0 }
 0x131   : > { %v625_v34 = vadd.f32 %v1813_v36, %v624_v28 }
 0x132   : > { %v869_v35 = vpop.f32.mrf.mxu1 }
 0x133   : > { %v870_v37 = vadd.f32 %v1962_v54, %v869_v35  ;;  %1572 = vmatmul.msk.f32.gmra.mxu0 %vm354_vm0, %v318_v30  ;;  %v776_v39 = vmax.f32 %v625_v34, 0.0 }
 0x135   : > { %916 = vmatmul.f32.gmra.mxu1 %v776_v39  ;;  %v1053_v42 = vmax.f32 %v870_v37, 0.0  ;;  %v325_v37 = vld [vmem:[%s1728_s15 + $0x158] sm:$0xff] }
 0x137   : > { %1161 = vmatmul.f32.gmra.mxu2 %v1053_v42 }
 0x138   : > { %v627_v43 = vpop.f32.mrf.mxu0 }
 0x139   : > { %v628_v45 = vadd.f32 %v1813_v36, %v627_v43 }
 0x13a   : > { %v872_v46 = vpop.f32.mrf.mxu1 }
 0x13b   : > { %v873_v47 = vadd.f32 %v1962_v54, %v872_v46  ;;  %1573 = vmatmul.msk.f32.gmra.mxu0 %vm354_vm0, %v319_v44  ;;  %v777_v48 = vmax.f32 %v628_v45, 0.0 }
 0x13d   : > { %919 = vmatmul.f32.gmra.mxu1 %v777_v48  ;;  %v1054_v49 = vmax.f32 %v873_v47, 0.0  ;;  %v326_v47 = vld [vmem:[%s1728_s15 + $0x160] sm:$0xff] }
 0x13f   : > { %1164 = vmatmul.f32.gmra.mxu2 %v1054_v49 }
 0x140   : > { %v630_v50 = vpop.f32.mrf.mxu0 }
 0x141   : > { %v631_v52 = vadd.f32 %v1813_v36, %v630_v50 }
 0x142   : > { %v875_v53 = vpop.f32.mrf.mxu1 }
 0x143   : > { %v876_v55 = vadd.f32 %v1962_v54, %v875_v53  ;;  %1574 = vmatmul.msk.f32.gmra.mxu0 %vm354_vm0, %v320_v51  ;;  %v778_v56 = vmax.f32 %v631_v52, 0.0 }
 0x145   : > { %922 = vmatmul.f32.gmra.mxu1 %v778_v56  ;;  %v1055_v57 = vmax.f32 %v876_v55, 0.0  ;;  %v327_v55 = vld [vmem:[%s1728_s15 + $0x168] sm:$0xff] }
 0x147   : > { %1167 = vmatmul.f32.gmra.mxu2 %v1055_v57 }
 0x148   : > { %v633_v58 = vpop.f32.mrf.mxu0 }
 0x149   : > { %v634_v60 = vadd.f32 %v1813_v36, %v633_v58 }
 0x14a   : > { %v878_v61 = vpop.f32.mrf.mxu1 }
 0x14b   : > { %v879_v62 = vadd.f32 %v1962_v54, %v878_v61  ;;  %1575 = vmatmul.msk.f32.gmra.mxu0 %vm354_vm0, %v321_v59  ;;  %v779_v63 = vmax.f32 %v634_v60, 0.0  ;;  %v332_v60 = vld [vmem:[%s1728_s15 + $0x190] sm:$0xff] }
 0x14c   : > { %1586 = vmatmul.msk.f32.vlgmr.msra.gmra.mxu3 %vm354_vm0, %v332_v60 }
 0x14d   : > { %925 = vmatmul.f32.gmra.mxu1 %v779_v63  ;;  %v1056_v0 = vmax.f32 %v879_v62, 0.0  ;;  %1622 = vmatpush.msra.mxu3 %v1845_v9  ;;  %v328_v63 = vld [vmem:[%s1728_s15 + $0x170] sm:$0xff] }
 0x14f   : > { %1170 = vmatmul.f32.gmra.mxu2 %v1056_v0  ;;  %1623 = vmatpush.msra.mxu3 %v1853_v13 }
 0x150   : > { %v636_v1 = vpop.f32.mrf.mxu0 }
 0x151   : > { %v637_v3 = vadd.f32 %v1813_v36, %v636_v1  ;;  %1624 = vmatpush.msra.mxu3 %v1860_v15 }
 0x152   : > { %v881_v4 = vpop.f32.mrf.mxu1 }
 0x153   : > { %v780_v5 = vmax.f32 %v637_v3, 0.0  ;;  %v882_v6 = vadd.f32 %v1962_v54, %v881_v4  ;;  %1576 = vmatmul.msk.f32.gmra.mxu0 %vm354_vm0, %v322_v2  ;;  %v333_v4 = vld [vmem:[%s1728_s15 + $0x198] sm:$0xff]  ;;  %1625 = vmatpush.msra.mxu3 %v1866_v16 }
 0x154   : > { %1587 = vmatmul.msk.f32.gmra.mxu3 %vm354_vm0, %v333_v4 }
 0x155   : > { %928 = vmatmul.f32.gmra.mxu1 %v780_v5  ;;  %v1057_v7 = vmax.f32 %v882_v6, 0.0  ;;  %1626 = vmatpush.msra.mxu3 %v1872_v17  ;;  %v329_v5 = vld [vmem:[%s1728_s15 + $0x178] sm:$0xff] }
 0x157   : > { %1173 = vmatmul.f32.gmra.mxu2 %v1057_v7  ;;  %1627 = vmatpush.msra.mxu3 %v1880_v21 }
 0x158   : > { %v639_v8 = vpop.f32.mrf.mxu0 }
 0x159   : > { %v640_v11 = vadd.f32 %v1813_v36, %v639_v8  ;;  %1628 = vmatpush.msra.mxu3 %v1887_v23  ;;  %v334_v8 = vld [vmem:[%s1728_s15 + $0x1a0] sm:$0xff] }
 0x15a   : > { %v884_v12 = vpop.f32.mrf.mxu1 }
 0x15b   : > { %v781_v14 = vmax.f32 %v640_v11, 0.0  ;;  %v885_v18 = vadd.f32 %v1962_v54, %v884_v12  ;;  %1577 = vmatmul.msk.f32.gmra.mxu0 %vm354_vm0, %v323_v10  ;;  %1629 = vmatpush.msra.mxu3 %v1893_v24  ;;  %v330_v10 = vld [vmem:[%s1728_s15 + $0x180] sm:$0xff] }
 0x15c   : > { %1588 = vmatmul.msk.f32.gmra.mxu3 %vm354_vm0, %v334_v8 }
 0x15d   : > { %931 = vmatmul.f32.gmra.mxu1 %v781_v14  ;;  %v1058_v19 = vmax.f32 %v885_v18, 0.0  ;;  %1630 = vmatpush.msra.mxu3 %v1899_v25  ;;  %v335_v14 = vld [vmem:[%s1728_s15 + $0x1a8] sm:$0xff] }
 0x15e   : > { %v331_v18 = vld [vmem:[%s1728_s15 + $0x188] sm:$0xff] }
 0x15f   : > { %1176 = vmatmul.f32.gmra.mxu2 %v1058_v19  ;;  %1631 = vmatpush.msra.mxu3 %v1907_v29  ;;  %v2056_v29 = vld [vmem:[%s2384_s6] ss:$0 sm:$0xff] }
 0x160   : > { %v642_v20 = vpop.f32.mrf.mxu0 }
 0x161   : > { %v643_v26 = vadd.f32 %v1813_v36, %v642_v20  ;;  %1632 = vmatpush.msra.mxu3 %v1914_v31 }
 0x162   : > { %v887_v27 = vpop.f32.mrf.mxu1 }
 0x163   : > { %v782_v28 = vmax.f32 %v643_v26, 0.0  ;;  %v888_v30 = vadd.f32 %v1962_v54, %v887_v27  ;;  %1578 = vmatmul.msk.f32.gmra.mxu0 %vm354_vm0, %v324_v22  ;;  %1633 = vmatpush.msra.mxu3 %v1920_v32 }
 0x164   : > { %1589 = vmatmul.msk.f32.gmra.mxu3 %vm354_vm0, %v335_v14 }
 0x165   : > { %934 = vmatmul.f32.gmra.mxu1 %v782_v28  ;;  %v1059_v34 = vmax.f32 %v888_v30, 0.0  ;;  %1634 = vmatpush.msra.mxu3 %v1926_v33 }
 0x167   : > { %1179 = vmatmul.f32.gmra.mxu2 %v1059_v34  ;;  %1635 = vmatpush.msra.mxu3 %v1934_v38  ;;  %v336_v38 = vld [vmem:[%s1728_s15 + $0x1b0] sm:$0xff] }
 0x168   : > { %v645_v35 = vpop.f32.mrf.mxu0 }
 0x169   : > { %v646_v39 = vadd.f32 %v1813_v36, %v645_v35  ;;  %1636 = vmatpush.msra.mxu3 %v1941_v40 }
 0x16a   : > { %v890_v42 = vpop.f32.mrf.mxu1 }
 0x16b   : > { %v783_v43 = vmax.f32 %v646_v39, 0.0  ;;  %v891_v44 = vadd.f32 %v1962_v54, %v890_v42  ;;  %1579 = vmatmul.msk.f32.gmra.mxu0 %vm354_vm0, %v325_v37  ;;  %1637 = vmatpush.msra.mxu3 %v1947_v41  ;;  %v337_v42 = vld [vmem:[%s1728_s15 + $0x1b8] sm:$0xff] }
 0x16c   : > { %1590 = vmatmul.msk.f32.gmra.mxu3 %vm354_vm0, %v336_v38 }
 0x16d   : > { %937 = vmatmul.f32.gmra.mxu1 %v783_v43  ;;  %v1060_v45 = vmax.f32 %v891_v44, 0.0 }
 0x16f   : > { %1182 = vmatmul.f32.gmra.mxu2 %v1060_v45 }
 0x170   : > { %v648_v46 = vpop.f32.mrf.mxu0 }
 0x171   : > { %v649_v48 = vadd.f32 %v1813_v36, %v648_v46 }
 0x172   : > { %v893_v49 = vpop.f32.mrf.mxu1 }
 0x173   : > { %v784_v50 = vmax.f32 %v649_v48, 0.0  ;;  %v894_v51 = vadd.f32 %v1962_v54, %v893_v49  ;;  %1580 = vmatmul.msk.f32.gmra.mxu0 %vm354_vm0, %v326_v47 }
 0x174   : > { %1591 = vmatmul.msk.f32.gmra.mxu3 %vm354_vm0, %v337_v42 }
 0x175   : > { %940 = vmatmul.f32.gmra.mxu1 %v784_v50  ;;  %v1061_v52 = vmax.f32 %v894_v51, 0.0 }
 0x177   : > { %1185 = vmatmul.f32.gmra.mxu2 %v1061_v52  ;;  %v338_v52 = vld [vmem:[%s1728_s15 + $0x1c0] sm:$0xff] }
 0x178   : > { %v651_v53 = vpop.f32.mrf.mxu0 }
 0x179   : > { %v652_v56 = vadd.f32 %v1813_v36, %v651_v53 }
 0x17a   : > { %v896_v57 = vpop.f32.mrf.mxu1 }
 0x17b   : > { %v785_v58 = vmax.f32 %v652_v56, 0.0  ;;  %v897_v59 = vadd.f32 %v1962_v54, %v896_v57  ;;  %1581 = vmatmul.msk.f32.gmra.mxu0 %vm354_vm0, %v327_v55 }
 0x17c   : > { %1592 = vmatmul.msk.f32.gmra.mxu3 %vm354_vm0, %v338_v52 }
 0x17d   : > { %943 = vmatmul.f32.gmra.mxu1 %v785_v58  ;;  %v1062_v61 = vmax.f32 %v897_v59, 0.0 }
 0x17f   : > { %1188 = vmatmul.f32.gmra.mxu2 %v1062_v61 }
 0x180   : > { %v654_v62 = vpop.f32.mrf.mxu0 }
 0x181   : > { %v655_v0 = vadd.f32 %v1813_v36, %v654_v62 }
 0x182   : > { %v899_v1 = vpop.f32.mrf.mxu1 }
 0x183   : > { %v786_v2 = vmax.f32 %v655_v0, 0.0  ;;  %v900_v3 = vadd.f32 %v1962_v54, %v899_v1  ;;  %1582 = vmatmul.msk.f32.gmra.mxu0 %vm354_vm0, %v328_v63  ;;  %v339_v63 = vld [vmem:[%s1728_s15 + $0x1c8] sm:$0xff] }
 0x184   : > { %1593 = vmatmul.msk.f32.gmra.mxu3 %vm354_vm0, %v339_v63 }
 0x185   : > { %946 = vmatmul.f32.gmra.mxu1 %v786_v2  ;;  %v1063_v9 = vmax.f32 %v900_v3, 0.0 }
 0x187   : > { %1191 = vmatmul.f32.gmra.mxu2 %v1063_v9 }
 0x188   : > { %v657_v13 = vpop.f32.mrf.mxu0 }
 0x189   : > { %v658_v15 = vadd.f32 %v1813_v36, %v657_v13 }
 0x18a   : > { %v902_v6 = vpop.f32.mrf.mxu1 }
 0x18b   : > { %v787_v7 = vmax.f32 %v658_v15, 0.0  ;;  %v903_v16 = vadd.f32 %v1962_v54, %v902_v6  ;;  %1583 = vmatmul.msk.f32.gmra.mxu0 %vm354_vm0, %v329_v5  ;;  %v340_v6 = vld [vmem:[%s1728_s15 + $0x1d0] sm:$0xff] }
 0x18c   : > { %1594 = vmatmul.msk.f32.gmra.mxu3 %vm354_vm0, %v340_v6 }
 0x18d   : > { %949 = vmatmul.f32.gmra.mxu1 %v787_v7  ;;  %v1064_v17 = vmax.f32 %v903_v16, 0.0 }
 0x18f   : > { %1194 = vmatmul.f32.gmra.mxu2 %v1064_v17 }
 0x190   : > { %v660_v21 = vpop.f32.mrf.mxu0 }
 0x191   : > { %v661_v23 = vadd.f32 %v1813_v36, %v660_v21 }
 0x192   : > { %v905_v11 = vpop.f32.mrf.mxu1 }
 0x193   : > { %v788_v12 = vmax.f32 %v661_v23, 0.0  ;;  %v906_v24 = vadd.f32 %v1962_v54, %v905_v11  ;;  %1584 = vmatmul.msk.f32.gmra.mxu0 %vm354_vm0, %v330_v10 }
 0x195   : > { %952 = vmatmul.f32.gmra.mxu1 %v788_v12  ;;  %v1065_v25 = vmax.f32 %v906_v24, 0.0  ;;  %v341_v24 = vld [vmem:[%s1728_s15 + $0x1d8] sm:$0xff] }
 0x196   : > { %1595 = vmatmul.msk.f32.gmra.mxu3 %vm354_vm0, %v341_v24 }
 0x197   : > { %1197 = vmatmul.f32.gmra.mxu2 %v1065_v25 }
 0x198   : > { %v663_v31 = vpop.f32.mrf.mxu0 }
 0x199   : > { %v664_v32 = vadd.f32 %v1813_v36, %v663_v31 }
 0x19a   : > { %v908_v19 = vpop.f32.mrf.mxu1  ;;  %v1150_v20 = vpop.f32.mrf.mxu2 }
 0x19b   : > { %v789_v22 = vmax.f32 %v664_v32, 0.0  ;;  %v909_v33 = vadd.f32 %v1962_v54, %v908_v19  ;;  %v1151_v26 = vadd.f32 %v2056_v29, %v1150_v20  ;;  %1585 = vmatmul.msk.f32.gmra.mxu0 %vm354_vm0, %v331_v18 }
 0x19d   : > { %v1342_v40 = vmax.f32 %v1151_v26, 0.0  ;;  %955 = vmatmul.f32.gmra.mxu1 %v789_v22  ;;  %v1066_v27 = vmax.f32 %v909_v33, 0.0  ;;  %v342_v26 = vld [vmem:[%s1728_s15 + $0x1e0] sm:$0xff] }
 0x19e   : > { %1596 = vmatmul.msk.f32.gmra.mxu3 %vm354_vm0, %v342_v26 }
 0x19f   : > { %1407 = vst.msk [vmem:[%s2070_s10] sm:$0xff] %vm1406_vm1, %v1342_v40  ;;  %1200 = vmatmul.f32.gmra.mxu2 %v1066_v27 }
 0x1a0   : > { %v666_v28 = vpop.f32.mrf.mxu0 }
 0x1a1   : > { %v667_v30 = vadd.f32 %v1813_v36, %v666_v28 }
 0x1a2   : > { %v911_v34 = vpop.f32.mrf.mxu1  ;;  %v1153_v35 = vpop.f32.mrf.mxu2 }
 0x1a3   : > { %v790_v37 = vmax.f32 %v667_v30, 0.0  ;;  %v912_v39 = vadd.f32 %v1962_v54, %v911_v34  ;;  %v1154_v41 = vadd.f32 %v2056_v29, %v1153_v35 }
 0x1a5   : > { %v1343_v43 = vmax.f32 %v1154_v41, 0.0  ;;  %958 = vmatmul.f32.gmra.mxu1 %v790_v37  ;;  %v1067_v44 = vmax.f32 %v912_v39, 0.0  ;;  %v343_v41 = vld [vmem:[%s1728_s15 + $0x1e8] sm:$0xff] }
 0x1a6   : > { %1597 = vmatmul.msk.f32.gmra.mxu3 %vm354_vm0, %v343_v41  ;;  %v2163_v41 = vld [vmem:[%s2380_s2] ss:$0 sm:$0xff] }
 0x1a7   : > { %1408 = vst.msk [vmem:[%s2070_s10 + $0x8] sm:$0xff] %vm1406_vm1, %v1343_v43  ;;  %1203 = vmatmul.f32.gmra.mxu2 %v1067_v44 }
 0x1a8   : > { %v669_v45 = vpop.f32.mrf.mxu0 }
 0x1a9   : > { %v670_v46 = vadd.f32 %v1813_v36, %v669_v45 }
 0x1aa   : > { %v914_v47 = vpop.f32.mrf.mxu1  ;;  %v1156_v48 = vpop.f32.mrf.mxu2 }
 0x1ab   : > { %v791_v49 = vmax.f32 %v670_v46, 0.0  ;;  %v915_v50 = vadd.f32 %v1962_v54, %v914_v47  ;;  %v1157_v51 = vadd.f32 %v2056_v29, %v1156_v48 }
 0x1ad   : > { %v1344_v53 = vmax.f32 %v1157_v51, 0.0  ;;  %961 = vmatmul.f32.gmra.mxu1 %v791_v49  ;;  %v1068_v55 = vmax.f32 %v915_v50, 0.0  ;;  %v344_v51 = vld [vmem:[%s1728_s15 + $0x1f0] sm:$0xff] }
 0x1ae   : > { %1598 = vmatmul.msk.f32.gmra.mxu3 %vm354_vm0, %v344_v51 }
 0x1af   : > { %1409 = vst.msk [vmem:[%s2070_s10 + $0x10] sm:$0xff] %vm1406_vm1, %v1344_v53  ;;  %1206 = vmatmul.f32.gmra.mxu2 %v1068_v55 }
 0x1b0   : > { %v672_v56 = vpop.f32.mrf.mxu0 }
 0x1b1   : > { %v673_v57 = vadd.f32 %v1813_v36, %v672_v56 }
 0x1b2   : > { %v917_v58 = vpop.f32.mrf.mxu1  ;;  %v1159_v59 = vpop.f32.mrf.mxu2 }
 0x1b3   : > { %v792_v60 = vmax.f32 %v673_v57, 0.0  ;;  %v918_v61 = vadd.f32 %v1962_v54, %v917_v58  ;;  %v1160_v62 = vadd.f32 %v2056_v29, %v1159_v59 }
 0x1b5   : > { %v1345_v0 = vmax.f32 %v1160_v62, 0.0  ;;  %964 = vmatmul.f32.gmra.mxu1 %v792_v60  ;;  %v1069_v1 = vmax.f32 %v918_v61, 0.0  ;;  %v345_v62 = vld [vmem:[%s1728_s15 + $0x1f8] sm:$0xff] }
 0x1b6   : > { %1599 = vmatmul.msk.f32.gmra.mxu3 %vm354_vm0, %v345_v62 }
 0x1b7   : > { %1410 = vst.msk [vmem:[%s2070_s10 + $0x18] sm:$0xff] %vm1406_vm1, %v1345_v0  ;;  %1209 = vmatmul.f32.gmra.mxu2 %v1069_v1 }
 0x1b8   : > { %v675_v2 = vpop.f32.mrf.mxu0 }
 0x1b9   : > { %v676_v3 = vadd.f32 %v1813_v36, %v675_v2 }
 0x1ba   : > { %v920_v4 = vpop.f32.mrf.mxu1  ;;  %v1162_v9 = vpop.f32.mrf.mxu2 }
 0x1bb   : > { %v793_v13 = vmax.f32 %v676_v3, 0.0  ;;  %v921_v5 = vadd.f32 %v1962_v54, %v920_v4  ;;  %v1163_v15 = vadd.f32 %v2056_v29, %v1162_v9 }
 0x1bd   : > { %v1346_v7 = vmax.f32 %v1163_v15, 0.0  ;;  %967 = vmatmul.f32.gmra.mxu1 %v793_v13  ;;  %v1070_v16 = vmax.f32 %v921_v5, 0.0 }
 0x1bf   : > { %1411 = vst.msk [vmem:[%s2070_s10 + $0x20] sm:$0xff] %vm1406_vm1, %v1346_v7  ;;  %1212 = vmatmul.f32.gmra.mxu2 %v1070_v16 }
 0x1c0   : > { %v678_v8 = vpop.f32.mrf.mxu0 }
 0x1c1   : > { %v679_v17 = vadd.f32 %v1813_v36, %v678_v8 }
 0x1c2   : > { %v923_v21 = vpop.f32.mrf.mxu1  ;;  %v1165_v10 = vpop.f32.mrf.mxu2 }
 0x1c3   : > { %v794_v23 = vmax.f32 %v679_v17, 0.0  ;;  %v924_v11 = vadd.f32 %v1962_v54, %v923_v21  ;;  %v1166_v12 = vadd.f32 %v2056_v29, %v1165_v10 }
 0x1c5   : > { %v1347_v14 = vmax.f32 %v1166_v12, 0.0  ;;  %970 = vmatmul.f32.gmra.mxu1 %v794_v23  ;;  %v1071_v25 = vmax.f32 %v924_v11, 0.0 }
 0x1c7   : > { %1412 = vst.msk [vmem:[%s2070_s10 + $0x28] sm:$0xff] %vm1406_vm1, %v1347_v14  ;;  %1215 = vmatmul.f32.gmra.mxu2 %v1071_v25 }
 0x1c8   : > { %v681_v31 = vpop.f32.mrf.mxu0 }
 0x1c9   : > { %v682_v18 = vadd.f32 %v1813_v36, %v681_v31 }
 0x1ca   : > { %v926_v32 = vpop.f32.mrf.mxu1  ;;  %v1168_v19 = vpop.f32.mrf.mxu2 }
 0x1cb   : > { %v795_v20 = vmax.f32 %v682_v18, 0.0  ;;  %v927_v22 = vadd.f32 %v1962_v54, %v926_v32  ;;  %v1169_v33 = vadd.f32 %v2056_v29, %v1168_v19 }
 0x1cd   : > { %v1348_v38 = vmax.f32 %v1169_v33, 0.0  ;;  %973 = vmatmul.f32.gmra.mxu1 %v795_v20  ;;  %v1072_v40 = vmax.f32 %v927_v22, 0.0 }
 0x1cf   : > { %1413 = vst.msk [vmem:[%s2070_s10 + $0x30] sm:$0xff] %vm1406_vm1, %v1348_v38  ;;  %1218 = vmatmul.f32.gmra.mxu2 %v1072_v40  ;;  %v714_v26 = vpop.f32.mrf.mxu3 }
 0x1d0   : > { %v684_v27 = vpop.f32.mrf.mxu0 }
 0x1d1   : > { %v685_v28 = vadd.f32 %v1813_v36, %v684_v27 }
 0x1d2   : > { %v929_v30 = vpop.f32.mrf.mxu1  ;;  %v1171_v34 = vpop.f32.mrf.mxu2 }
 0x1d3   : > { %v796_v35 = vmax.f32 %v685_v28, 0.0  ;;  %v930_v37 = vadd.f32 %v1962_v54, %v929_v30  ;;  %v1172_v39 = vadd.f32 %v2056_v29, %v1171_v34 }
 0x1d5   : > { %v1073_v42 = vmax.f32 %v930_v37, 0.0  ;;  %v1349_v43 = vmax.f32 %v1172_v39, 0.0  ;;  %976 = vmatmul.f32.gmra.mxu1 %v796_v35 }
 0x1d7   : > { %1414 = vst.msk [vmem:[%s2070_s10 + $0x38] sm:$0xff] %vm1406_vm1, %v1349_v43  ;;  %1221 = vmatmul.f32.gmra.mxu2 %v1073_v42  ;;  %v717_v42 = vpop.f32.mrf.mxu3 }
 0x1d8   : > { %v687_v44 = vpop.f32.mrf.mxu0 }
 0x1d9   : > { %v688_v45 = vadd.f32 %v1813_v36, %v687_v44 }
 0x1da   : > { %v932_v46 = vpop.f32.mrf.mxu1  ;;  %v1174_v47 = vpop.f32.mrf.mxu2 }
 0x1db   : > { %v797_v48 = vmax.f32 %v688_v45, 0.0  ;;  %v933_v49 = vadd.f32 %v1962_v54, %v932_v46  ;;  %v1175_v50 = vadd.f32 %v2056_v29, %v1174_v47 }
 0x1dd   : > { %v1074_v52 = vmax.f32 %v933_v49, 0.0  ;;  %v1350_v53 = vmax.f32 %v1175_v50, 0.0  ;;  %979 = vmatmul.f32.gmra.mxu1 %v797_v48 }
 0x1df   : > { %1415 = vst.msk [vmem:[%s2070_s10 + $0x40] sm:$0xff] %vm1406_vm1, %v1350_v53  ;;  %1224 = vmatmul.f32.gmra.mxu2 %v1074_v52 }
 0x1e0   : > { %v690_v55 = vpop.f32.mrf.mxu0 }
 0x1e1   : > { %v691_v56 = vadd.f32 %v1813_v36, %v690_v55 }
 0x1e2   : > { %v935_v57 = vpop.f32.mrf.mxu1  ;;  %v1177_v58 = vpop.f32.mrf.mxu2 }
 0x1e3   : > { %v798_v59 = vmax.f32 %v691_v56, 0.0  ;;  %v936_v60 = vadd.f32 %v1962_v54, %v935_v57  ;;  %v1178_v61 = vadd.f32 %v2056_v29, %v1177_v58  ;;  %v720_v58 = vpop.f32.mrf.mxu3 }
 0x1e5   : > { %v1075_v63 = vmax.f32 %v936_v60, 0.0  ;;  %v1351_v0 = vmax.f32 %v1178_v61, 0.0  ;;  %982 = vmatmul.f32.gmra.mxu1 %v798_v59 }
 0x1e7   : > { %1416 = vst.msk [vmem:[%s2070_s10 + $0x48] sm:$0xff] %vm1406_vm1, %v1351_v0  ;;  %1227 = vmatmul.f32.gmra.mxu2 %v1075_v63 }
 0x1e8   : > { %v693_v1 = vpop.f32.mrf.mxu0 }
 0x1e9   : > { %v694_v2 = vadd.f32 %v1813_v36, %v693_v1 }
 0x1ea   : > { %v938_v3 = vpop.f32.mrf.mxu1  ;;  %v1180_v4 = vpop.f32.mrf.mxu2 }
 0x1eb   : > { %v799_v9 = vmax.f32 %v694_v2, 0.0  ;;  %v939_v13 = vadd.f32 %v1962_v54, %v938_v3  ;;  %v1181_v5 = vadd.f32 %v2056_v29, %v1180_v4 }
 0x1ed   : > { %v1076_v15 = vmax.f32 %v939_v13, 0.0  ;;  %v1352_v6 = vmax.f32 %v1181_v5, 0.0  ;;  %985 = vmatmul.f32.gmra.mxu1 %v799_v9  ;;  %v715_v13 = vadd.f32 %v2163_v41, %v714_v26  ;;  %v723_v5 = vpop.f32.mrf.mxu3 }
 0x1ef   : > { %1417 = vst.msk [vmem:[%s2070_s10 + $0x50] sm:$0xff] %vm1406_vm1, %v1352_v6  ;;  %1230 = vmatmul.f32.gmra.mxu2 %v1076_v15  ;;  %v806_v15 = vmax.f32 %v715_v13, 0.0 }
 0x1f0   : > { %v696_v7 = vpop.f32.mrf.mxu0 }
 0x1f1   : > { %v697_v16 = vadd.f32 %v1813_v36, %v696_v7 }
 0x1f2   : > { %v941_v8 = vpop.f32.mrf.mxu1  ;;  %v1183_v17 = vpop.f32.mrf.mxu2 }
 0x1f3   : > { %v800_v21 = vmax.f32 %v697_v16, 0.0  ;;  %v942_v10 = vadd.f32 %v1962_v54, %v941_v8  ;;  %v1184_v23 = vadd.f32 %v2056_v29, %v1183_v17 }
 0x1f5   : > { %v1077_v11 = vmax.f32 %v942_v10, 0.0  ;;  %v1353_v12 = vmax.f32 %v1184_v23, 0.0  ;;  %988 = vmatmul.f32.gmra.mxu1 %v800_v21  ;;  %v718_v10 = vadd.f32 %v2163_v41, %v717_v42  ;;  %v726_v23 = vpop.f32.mrf.mxu3 }
 0x1f7   : > { %1418 = vst.msk [vmem:[%s2070_s10 + $0x58] sm:$0xff] %vm1406_vm1, %v1353_v12  ;;  %1233 = vmatmul.f32.gmra.mxu2 %v1077_v11  ;;  %v807_v11 = vmax.f32 %v718_v10, 0.0 }
 0x1f8   : > { %v699_v24 = vpop.f32.mrf.mxu0 }
 0x1f9   : > { %v700_v14 = vadd.f32 %v1813_v36, %v699_v24 }
 0x1fa   : > { %v944_v25 = vpop.f32.mrf.mxu1  ;;  %v1186_v31 = vpop.f32.mrf.mxu2 }
 0x1fb   : > { %v801_v18 = vmax.f32 %v700_v14, 0.0  ;;  %v945_v32 = vadd.f32 %v1962_v54, %v944_v25  ;;  %v1187_v19 = vadd.f32 %v2056_v29, %v1186_v31 }
 0x1fd   : > { %v1078_v20 = vmax.f32 %v945_v32, 0.0  ;;  %v1354_v22 = vmax.f32 %v1187_v19, 0.0  ;;  %991 = vmatmul.f32.gmra.mxu1 %v801_v18  ;;  %v721_v32 = vadd.f32 %v2163_v41, %v720_v58 }
 0x1ff   : > { %1419 = vst.msk [vmem:[%s2070_s10 + $0x60] sm:$0xff] %vm1406_vm1, %v1354_v22  ;;  %1236 = vmatmul.f32.gmra.mxu2 %v1078_v20  ;;  %v808_v19 = vmax.f32 %v721_v32, 0.0  ;;  %v729_v20 = vpop.f32.mrf.mxu3 }
 0x200   : > { %v702_v33 = vpop.f32.mrf.mxu0 }
 0x201   : > { %v703_v38 = vadd.f32 %v1813_v36, %v702_v33 }
 0x202   : > { %v947_v40 = vpop.f32.mrf.mxu1  ;;  %v1189_v27 = vpop.f32.mrf.mxu2 }
 0x203   : > { %v802_v28 = vmax.f32 %v703_v38, 0.0  ;;  %v948_v30 = vadd.f32 %v1962_v54, %v947_v40  ;;  %v1190_v34 = vadd.f32 %v2056_v29, %v1189_v27 }
 0x205   : > { %v1079_v35 = vmax.f32 %v948_v30, 0.0  ;;  %v1355_v37 = vmax.f32 %v1190_v34, 0.0  ;;  %994 = vmatmul.f32.gmra.mxu1 %v802_v28  ;;  %v724_v28 = vadd.f32 %v2163_v41, %v723_v5 }
 0x207   : > { %1420 = vst.msk [vmem:[%s2070_s10 + $0x68] sm:$0xff] %vm1406_vm1, %v1355_v37  ;;  %1239 = vmatmul.f32.gmra.mxu2 %v1079_v35  ;;  %v809_v30 = vmax.f32 %v724_v28, 0.0 }
 0x208   : > { %v705_v39 = vpop.f32.mrf.mxu0 }
 0x209   : > { %v706_v36 = vadd.f32 %v2163_v41, %v705_v39 }
 0x20a   : > { %v950_v43 = vpop.f32.mrf.mxu1  ;;  %v1192_v44 = vpop.f32.mrf.mxu2 }
 0x20b   : > { %v803_v45 = vmax.f32 %v706_v36, 0.0  ;;  %v951_v46 = vadd.f32 %v1962_v54, %v950_v43  ;;  %v1193_v47 = vadd.f32 %v2056_v29, %v1192_v44  ;;  %v732_v36 = vpop.f32.mrf.mxu3  ;;  %v727_v44 = vadd.f32 %v2163_v41, %v726_v23 }
 0x20d   : > { %v1080_v48 = vmax.f32 %v951_v46, 0.0  ;;  %v1356_v49 = vmax.f32 %v1193_v47, 0.0  ;;  %997 = vmatmul.f32.gmra.mxu1 %v803_v45  ;;  %v810_v45 = vmax.f32 %v727_v44, 0.0 }
 0x20f   : > { %1421 = vst.msk [vmem:[%s2070_s10 + $0x70] sm:$0xff] %vm1406_vm1, %v1356_v49  ;;  %1242 = vmatmul.f32.gmra.mxu2 %v1080_v48 }
 0x210   : > { %v708_v50 = vpop.f32.mrf.mxu0 }
 0x211   : > { %v709_v51 = vadd.f32 %v2163_v41, %v708_v50 }
 0x212   : > { %v953_v52 = vpop.f32.mrf.mxu1  ;;  %v1195_v53 = vpop.f32.mrf.mxu2 }
 0x213   : > { %v804_v55 = vmax.f32 %v709_v51, 0.0  ;;  %v954_v56 = vadd.f32 %v1962_v54, %v953_v52  ;;  %v1196_v57 = vadd.f32 %v2056_v29, %v1195_v53  ;;  %v730_v52 = vadd.f32 %v2163_v41, %v729_v20  ;;  %v735_v53 = vpop.f32.mrf.mxu3 }
 0x214   : > { %v736_v5 = vadd.f32 %v2163_v41, %v735_v53 }
 0x215   : > { %v1081_v59 = vmax.f32 %v954_v56, 0.0  ;;  %v1357_v60 = vmax.f32 %v1196_v57, 0.0  ;;  %1000 = vmatmul.f32.vlgmr.msrb.gmra.mxu3 %v804_v55  ;;  %v811_v55 = vmax.f32 %v730_v52, 0.0 }
 0x217   : > { %1422 = vst.msk [vmem:[%s2070_s10 + $0x78] sm:$0xff] %vm1406_vm1, %v1357_v60  ;;  %1245 = vmatmul.f32.gmra.mxu2 %v1081_v59 }
 0x218   : > { %v711_v61 = vpop.f32.mrf.mxu0 }
 0x219   : > { %v712_v62 = vadd.f32 %v2163_v41, %v711_v61 }
 0x21a   : > { %v956_v63 = vpop.f32.mrf.mxu1  ;;  %v1198_v0 = vpop.f32.mrf.mxu2 }
 0x21b   : > { %v805_v1 = vmax.f32 %v712_v62, 0.0  ;;  %v957_v2 = vadd.f32 %v1962_v54, %v956_v63  ;;  %v1199_v3 = vadd.f32 %v2056_v29, %v1198_v0  ;;  %v733_v62 = vadd.f32 %v2163_v41, %v732_v36  ;;  %v738_v63 = vpop.f32.mrf.mxu3 }
 0x21c   : > { %v739_v23 = vadd.f32 %v2163_v41, %v738_v63 }
 0x21d   : > { %v1082_v4 = vmax.f32 %v957_v2, 0.0  ;;  %v1358_v9 = vmax.f32 %v1199_v3, 0.0  ;;  %1003 = vmatmul.f32.gmra.mxu3 %v805_v1  ;;  %v812_v0 = vmax.f32 %v733_v62, 0.0 }
 0x21f   : > { %1423 = vst.msk [vmem:[%s2070_s10 + $0x80] sm:$0xff] %vm1406_vm1, %v1358_v9  ;;  %1248 = vmatmul.f32.gmra.mxu2 %v1082_v4 }
 0x222   : > { %v959_v6 = vpop.f32.mrf.mxu1  ;;  %v1201_v7 = vpop.f32.mrf.mxu2 }
 0x223   : > { %v960_v16 = vadd.f32 %v1962_v54, %v959_v6  ;;  %v1202_v8 = vadd.f32 %v2056_v29, %v1201_v7  ;;  %v741_v6 = vpop.f32.mrf.mxu3 }
 0x225   : > { %v1083_v17 = vmax.f32 %v960_v16, 0.0  ;;  %v1359_v21 = vmax.f32 %v1202_v8, 0.0  ;;  %1006 = vmatmul.f32.gmra.mxu3 %v806_v15  ;;  %v813_v15 = vmax.f32 %v736_v5, 0.0  ;;  %v2219_v8 = vld [vmem:[%s2382_s4] ss:$0 sm:$0xff] }
 0x227   : > { %1424 = vst.msk [vmem:[%s2070_s10 + $0x88] sm:$0xff] %vm1406_vm1, %v1359_v21  ;;  %1251 = vmatmul.f32.gmra.mxu2 %v1083_v17 }
 0x22a   : > { %v962_v12 = vpop.f32.mrf.mxu1  ;;  %v1204_v24 = vpop.f32.mrf.mxu2 }
 0x22b   : > { %v963_v14 = vadd.f32 %v1962_v54, %v962_v12  ;;  %v1205_v25 = vadd.f32 %v2056_v29, %v1204_v24 }
 0x22d   : > { %v1084_v31 = vmax.f32 %v963_v14, 0.0  ;;  %v1360_v18 = vmax.f32 %v1205_v25, 0.0  ;;  %1009 = vmatmul.f32.gmra.mxu3 %v807_v11  ;;  %v814_v11 = vmax.f32 %v739_v23, 0.0 }
 0x22f   : > { %1425 = vst.msk [vmem:[%s2070_s10 + $0x90] sm:$0xff] %vm1406_vm1, %v1360_v18  ;;  %1254 = vmatmul.f32.gmra.mxu2 %v1084_v31  ;;  %v744_v31 = vpop.f32.mrf.mxu3 }
 0x230   : > { %v745_v28 = vadd.f32 %v2163_v41, %v744_v31 }
 0x232   : > { %v965_v22 = vpop.f32.mrf.mxu1  ;;  %v1207_v33 = vpop.f32.mrf.mxu2 }
 0x233   : > { %v966_v26 = vadd.f32 %v1962_v54, %v965_v22  ;;  %v1208_v38 = vadd.f32 %v2056_v29, %v1207_v33 }
 0x235   : > { %v1085_v40 = vmax.f32 %v966_v26, 0.0  ;;  %v1361_v27 = vmax.f32 %v1208_v38, 0.0  ;;  %1012 = vmatmul.f32.gmra.mxu3 %v808_v19  ;;  %v742_v19 = vadd.f32 %v2163_v41, %v741_v6 }
 0x237   : > { %1426 = vst.msk [vmem:[%s2070_s10 + $0x98] sm:$0xff] %vm1406_vm1, %v1361_v27  ;;  %1257 = vmatmul.f32.gmra.mxu2 %v1085_v40  ;;  %v815_v20 = vmax.f32 %v742_v19, 0.0 }
 0x23a   : > { %v968_v34 = vpop.f32.mrf.mxu1  ;;  %v1210_v35 = vpop.f32.mrf.mxu2 }
 0x23b   : > { %v969_v37 = vadd.f32 %v1962_v54, %v968_v34  ;;  %v1211_v39 = vadd.f32 %v2056_v29, %v1210_v35  ;;  %v816_v34 = vmax.f32 %v745_v28, 0.0 }
 0x23d   : > { %v1086_v42 = vmax.f32 %v969_v37, 0.0  ;;  %v1362_v43 = vmax.f32 %v1211_v39, 0.0  ;;  %1015 = vmatmul.f32.gmra.mxu3 %v809_v30  ;;  %v747_v30 = vpop.f32.mrf.mxu3 }
 0x23e   : > { %v748_v44 = vadd.f32 %v2163_v41, %v747_v30 }
 0x23f   : > { %1427 = vst.msk [vmem:[%s2070_s10 + $0xa0] sm:$0xff] %vm1406_vm1, %v1362_v43  ;;  %1260 = vmatmul.f32.gmra.mxu2 %v1086_v42 }
 0x242   : > { %v971_v46 = vpop.f32.mrf.mxu1  ;;  %v1213_v47 = vpop.f32.mrf.mxu2 }
 0x243   : > { %v972_v48 = vadd.f32 %v1962_v54, %v971_v46  ;;  %v1214_v49 = vadd.f32 %v2056_v29, %v1213_v47  ;;  %v817_v46 = vmax.f32 %v748_v44, 0.0 }
 0x245   : > { %v1087_v50 = vmax.f32 %v972_v48, 0.0  ;;  %v1363_v51 = vmax.f32 %v1214_v49, 0.0  ;;  %1018 = vmatmul.f32.gmra.mxu3 %v810_v45  ;;  %v750_v45 = vpop.f32.mrf.mxu3 }
 0x246   : > { %v751_v53 = vadd.f32 %v2163_v41, %v750_v45 }
 0x247   : > { %1428 = vst.msk [vmem:[%s2070_s10 + $0xa8] sm:$0xff] %vm1406_vm1, %v1363_v51  ;;  %1263 = vmatmul.f32.gmra.mxu2 %v1087_v50 }
 0x24a   : > { %v974_v56 = vpop.f32.mrf.mxu1  ;;  %v1216_v57 = vpop.f32.mrf.mxu2 }
 0x24b   : > { %v975_v58 = vadd.f32 %v1962_v54, %v974_v56  ;;  %v1217_v59 = vadd.f32 %v2056_v29, %v1216_v57 }
 0x24d   : > { %v1088_v60 = vmax.f32 %v975_v58, 0.0  ;;  %v1364_v61 = vmax.f32 %v1217_v59, 0.0  ;;  %1021 = vmatmul.f32.gmra.mxu3 %v811_v55  ;;  %v818_v55 = vmax.f32 %v751_v53, 0.0  ;;  %v753_v56 = vpop.f32.mrf.mxu3 }
 0x24e   : > { %v754_v63 = vadd.f32 %v2163_v41, %v753_v56 }
 0x24f   : > { %1429 = vst.msk [vmem:[%s2070_s10 + $0xb0] sm:$0xff] %vm1406_vm1, %v1364_v61  ;;  %1266 = vmatmul.f32.gmra.mxu2 %v1088_v60 }
 0x252   : > { %v977_v1 = vpop.f32.mrf.mxu1  ;;  %v1219_v2 = vpop.f32.mrf.mxu2 }
 0x253   : > { %v978_v3 = vadd.f32 %v1962_v54, %v977_v1  ;;  %v1220_v4 = vadd.f32 %v2056_v29, %v1219_v2 }
 0x255   : > { %v1089_v9 = vmax.f32 %v978_v3, 0.0  ;;  %v1365_v13 = vmax.f32 %v1220_v4, 0.0  ;;  %1024 = vmatmul.f32.gmra.mxu3 %v812_v0  ;;  %v819_v0 = vmax.f32 %v754_v63, 0.0 }
 0x257   : > { %1430 = vst.msk [vmem:[%s2070_s10 + $0xb8] sm:$0xff] %vm1406_vm1, %v1365_v13  ;;  %1269 = vmatmul.f32.gmra.mxu2 %v1089_v9 }
 0x25a   : > { %v980_v7 = vpop.f32.mrf.mxu1  ;;  %v1222_v16 = vpop.f32.mrf.mxu2 }
 0x25b   : > { %v981_v54 = vadd.f32 %v2219_v8, %v980_v7  ;;  %v1223_v17 = vadd.f32 %v2056_v29, %v1222_v16 }
 0x25d   : > { %v1090_v21 = vmax.f32 %v981_v54, 0.0  ;;  %v1366_v10 = vmax.f32 %v1223_v17, 0.0  ;;  %1027 = vmatmul.f32.gmra.mxu3 %v813_v15 }
 0x25f   : > { %1431 = vst.msk [vmem:[%s2070_s10 + $0xc0] sm:$0xff] %vm1406_vm1, %v1366_v10  ;;  %1272 = vmatmul.f32.gmra.mxu2 %v1090_v21 }
 0x262   : > { %v983_v12 = vpop.f32.mrf.mxu1  ;;  %v1225_v24 = vpop.f32.mrf.mxu2 }
 0x263   : > { %v984_v14 = vadd.f32 %v2219_v8, %v983_v12  ;;  %v1226_v25 = vadd.f32 %v2056_v29, %v1225_v24 }
 0x265   : > { %v1091_v18 = vmax.f32 %v984_v14, 0.0  ;;  %v1367_v32 = vmax.f32 %v1226_v25, 0.0  ;;  %1030 = vmatmul.f32.gmra.mxu3 %v814_v11 }
 0x267   : > { %1432 = vst.msk [vmem:[%s2070_s10 + $0xc8] sm:$0xff] %vm1406_vm1, %v1367_v32  ;;  %1275 = vmatmul.f32.gmra.mxu2 %v1091_v18 }
 0x26a   : > { %v986_v22 = vpop.f32.mrf.mxu1  ;;  %v1228_v33 = vpop.f32.mrf.mxu2 }
 0x26b   : > { %v987_v26 = vadd.f32 %v2219_v8, %v986_v22  ;;  %v1229_v38 = vadd.f32 %v2056_v29, %v1228_v33 }
 0x26d   : > { %v1092_v40 = vmax.f32 %v987_v26, 0.0  ;;  %v1368_v27 = vmax.f32 %v1229_v38, 0.0  ;;  %1033 = vmatmul.f32.gmra.mxu3 %v815_v20 }
 0x26f   : > { %1433 = vst.msk [vmem:[%s2070_s10 + $0xd0] sm:$0xff] %vm1406_vm1, %v1368_v27  ;;  %1278 = vmatmul.f32.gmra.mxu2 %v1092_v40 }
 0x272   : > { %v989_v35 = vpop.f32.mrf.mxu1  ;;  %v1231_v37 = vpop.f32.mrf.mxu2 }
 0x273   : > { %v990_v39 = vadd.f32 %v2219_v8, %v989_v35  ;;  %v1232_v36 = vadd.f32 %v2056_v29, %v1231_v37 }
 0x275   : > { %v1093_v42 = vmax.f32 %v990_v39, 0.0  ;;  %v1369_v43 = vmax.f32 %v1232_v36, 0.0  ;;  %1036 = vmatmul.f32.gmra.mxu3 %v816_v34 }
 0x277   : > { %1434 = vst.msk [vmem:[%s2070_s10 + $0xd8] sm:$0xff] %vm1406_vm1, %v1369_v43  ;;  %1281 = vmatmul.f32.gmra.mxu2 %v1093_v42 }
 0x27a   : > { %v992_v47 = vpop.f32.mrf.mxu1  ;;  %v1234_v48 = vpop.f32.mrf.mxu2 }
 0x27b   : > { %v993_v49 = vadd.f32 %v2219_v8, %v992_v47  ;;  %v1235_v50 = vadd.f32 %v2056_v29, %v1234_v48 }
 0x27d   : > { %v1094_v51 = vmax.f32 %v993_v49, 0.0  ;;  %v1370_v52 = vmax.f32 %v1235_v50, 0.0  ;;  %1039 = vmatmul.f32.gmra.mxu3 %v817_v46 }
 0x27f   : > { %1435 = vst.msk [vmem:[%s2070_s10 + $0xe0] sm:$0xff] %vm1406_vm1, %v1370_v52  ;;  %1284 = vmatmul.f32.gmra.mxu2 %v1094_v51 }
 0x282   : > { %v995_v57 = vpop.f32.mrf.mxu1  ;;  %v1237_v58 = vpop.f32.mrf.mxu2 }
 0x283   : > { %v996_v59 = vadd.f32 %v2219_v8, %v995_v57  ;;  %v1238_v60 = vadd.f32 %v2056_v29, %v1237_v58 }
 0x285   : > { %v1095_v61 = vmax.f32 %v996_v59, 0.0  ;;  %v1371_v62 = vmax.f32 %v1238_v60, 0.0  ;;  %1042 = vmatmul.f32.gmra.mxu3 %v818_v55 }
 0x287   : > { %1436 = vst.msk [vmem:[%s2070_s10 + $0xe8] sm:$0xff] %vm1406_vm1, %v1371_v62  ;;  %1287 = vmatmul.f32.gmra.mxu2 %v1095_v61 }
 0x28a   : > { %v998_v1 = vpop.f32.mrf.mxu1  ;;  %v1240_v2 = vpop.f32.mrf.mxu2 }
 0x28b   : > { %v999_v3 = vadd.f32 %v2219_v8, %v998_v1  ;;  %v1241_v4 = vadd.f32 %v2056_v29, %v1240_v2 }
 0x28d   : > { %v1096_v9 = vmax.f32 %v999_v3, 0.0  ;;  %v1372_v13 = vmax.f32 %v1241_v4, 0.0  ;;  %1045 = vmatmul.f32.gmra.mxu3 %v819_v0 }
 0x28f   : > { %1437 = vst.msk [vmem:[%s2070_s10 + $0xf0] sm:$0xff] %vm1406_vm1, %v1372_v13  ;;  %1290 = vmatmul.f32.gmra.mxu2 %v1096_v9 }
 0x292   : > { %v1243_v5 = vpop.f32.mrf.mxu2 }
 0x293   : > { %v1244_v41 = vadd.f32 %v2056_v29, %v1243_v5 }
 0x295   : > { %v1373_v15 = vmax.f32 %v1244_v41, 0.0 }
 0x297   : > { %1438 = vst.msk [vmem:[%s2070_s10 + $0xf8] sm:$0xff] %vm1406_vm1, %v1373_v15 }
 0x298   : > { %v1001_v6 = vpop.f32.mrf.mxu3 }
 0x299   : > { %v1002_v7 = vadd.f32 %v2219_v8, %v1001_v6 }
 0x29a   : > { %v1246_v16 = vpop.f32.mrf.mxu2 }
 0x29b   : > { %v1097_v54 = vmax.f32 %v1002_v7, 0.0  ;;  %v1247_v17 = vadd.f32 %v2056_v29, %v1246_v16 }
 0x29d   : > { %v1374_v21 = vmax.f32 %v1247_v17, 0.0  ;;  %1293 = vmatmul.f32.vlgmr.msra.gmra.mxu3 %v1097_v54 }
 0x29f   : > { %1439 = vst.msk [vmem:[%s2070_s10 + $0x100] sm:$0xff] %vm1406_vm1, %v1374_v21 }
 0x2a0   : > { %v1004_v10 = vpop.f32.mrf.mxu3 }
 0x2a1   : > { %v1005_v23 = vadd.f32 %v2219_v8, %v1004_v10 }
 0x2a2   : > { %v1249_v11 = vpop.f32.mrf.mxu2 }
 0x2a3   : > { %v1098_v12 = vmax.f32 %v1005_v23, 0.0  ;;  %v1250_v24 = vadd.f32 %v2056_v29, %v1249_v11 }
 0x2a5   : > { %v1375_v14 = vmax.f32 %v1250_v24, 0.0  ;;  %1296 = vmatmul.f32.gmra.mxu3 %v1098_v12 }
 0x2a7   : > { %1440 = vst.msk [vmem:[%s2070_s10 + $0x108] sm:$0xff] %vm1406_vm1, %v1375_v14 }
 0x2a8   : > { %v1007_v25 = vpop.f32.mrf.mxu3 }
 0x2a9   : > { %v1008_v31 = vadd.f32 %v2219_v8, %v1007_v25 }
 0x2aa   : > { %v1252_v18 = vpop.f32.mrf.mxu2 }
 0x2ab   : > { %v1099_v32 = vmax.f32 %v1008_v31, 0.0  ;;  %v1253_v19 = vadd.f32 %v2056_v29, %v1252_v18 }
 0x2ad   : > { %v1376_v20 = vmax.f32 %v1253_v19, 0.0  ;;  %1299 = vmatmul.f32.gmra.mxu3 %v1099_v32 }
 0x2af   : > { %1441 = vst.msk [vmem:[%s2070_s10 + $0x110] sm:$0xff] %vm1406_vm1, %v1376_v20 }
 0x2b0   : > { %v1010_v22 = vpop.f32.mrf.mxu3 }
 0x2b1   : > { %v1011_v33 = vadd.f32 %v2219_v8, %v1010_v22 }
 0x2b2   : > { %v1255_v26 = vpop.f32.mrf.mxu2 }
 0x2b3   : > { %v1100_v38 = vmax.f32 %v1011_v33, 0.0  ;;  %v1256_v40 = vadd.f32 %v2056_v29, %v1255_v26  ;;  %v2314_v26 = vld [vmem:[%s2384_s6] ss:$0 sm:$0xff] }
 0x2b5   : > { %v1377_v27 = vmax.f32 %v1256_v40, 0.0  ;;  %1302 = vmatmul.f32.gmra.mxu3 %v1100_v38 }
 0x2b7   : > { %1442 = vst.msk [vmem:[%s2070_s10 + $0x118] sm:$0xff] %vm1406_vm1, %v1377_v27 }
 0x2b8   : > { %v1013_v28 = vpop.f32.mrf.mxu3 }
 0x2b9   : > { %v1014_v30 = vadd.f32 %v2219_v8, %v1013_v28 }
 0x2ba   : > { %v1258_v34 = vpop.f32.mrf.mxu2 }
 0x2bb   : > { %v1101_v35 = vmax.f32 %v1014_v30, 0.0  ;;  %v1259_v37 = vadd.f32 %v2056_v29, %v1258_v34 }
 0x2bd   : > { %v1378_v39 = vmax.f32 %v1259_v37, 0.0  ;;  %1305 = vmatmul.f32.gmra.mxu3 %v1101_v35 }
 0x2bf   : > { %1443 = vst.msk [vmem:[%s2070_s10 + $0x120] sm:$0xff] %vm1406_vm1, %v1378_v39 }
 0x2c0   : > { %v1016_v36 = vpop.f32.mrf.mxu3 }
 0x2c1   : > { %v1017_v42 = vadd.f32 %v2219_v8, %v1016_v36 }
 0x2c2   : > { %v1261_v43 = vpop.f32.mrf.mxu2 }
 0x2c3   : > { %v1102_v44 = vmax.f32 %v1017_v42, 0.0  ;;  %v1262_v45 = vadd.f32 %v2056_v29, %v1261_v43 }
 0x2c5   : > { %v1379_v46 = vmax.f32 %v1262_v45, 0.0  ;;  %1308 = vmatmul.f32.gmra.mxu3 %v1102_v44 }
 0x2c7   : > { %1444 = vst.msk [vmem:[%s2070_s10 + $0x128] sm:$0xff] %vm1406_vm1, %v1379_v46 }
 0x2c8   : > { %v1019_v47 = vpop.f32.mrf.mxu3 }
 0x2c9   : > { %v1020_v48 = vadd.f32 %v2219_v8, %v1019_v47 }
 0x2ca   : > { %v1264_v49 = vpop.f32.mrf.mxu2 }
 0x2cb   : > { %v1103_v50 = vmax.f32 %v1020_v48, 0.0  ;;  %v1265_v51 = vadd.f32 %v2056_v29, %v1264_v49 }
 0x2cd   : > { %v1380_v52 = vmax.f32 %v1265_v51, 0.0  ;;  %1311 = vmatmul.f32.gmra.mxu3 %v1103_v50 }
 0x2cf   : > { %1445 = vst.msk [vmem:[%s2070_s10 + $0x130] sm:$0xff] %vm1406_vm1, %v1380_v52 }
 0x2d0   : > { %v1022_v53 = vpop.f32.mrf.mxu3 }
 0x2d1   : > { %v1023_v55 = vadd.f32 %v2219_v8, %v1022_v53 }
 0x2d2   : > { %v1267_v56 = vpop.f32.mrf.mxu2 }
 0x2d3   : > { %v1104_v57 = vmax.f32 %v1023_v55, 0.0  ;;  %v1268_v58 = vadd.f32 %v2056_v29, %v1267_v56 }
 0x2d5   : > { %v1381_v59 = vmax.f32 %v1268_v58, 0.0  ;;  %1314 = vmatmul.f32.gmra.mxu3 %v1104_v57 }
 0x2d7   : > { %1446 = vst.msk [vmem:[%s2070_s10 + $0x138] sm:$0xff] %vm1406_vm1, %v1381_v59 }
 0x2d8   : > { %v1025_v60 = vpop.f32.mrf.mxu3 }
 0x2d9   : > { %v1026_v61 = vadd.f32 %v2219_v8, %v1025_v60 }
 0x2da   : > { %v1270_v62 = vpop.f32.mrf.mxu2 }
 0x2db   : > { %v1105_v63 = vmax.f32 %v1026_v61, 0.0  ;;  %v1271_v0 = vadd.f32 %v2056_v29, %v1270_v62 }
 0x2dd   : > { %v1382_v1 = vmax.f32 %v1271_v0, 0.0  ;;  %1317 = vmatmul.f32.gmra.mxu3 %v1105_v63 }
 0x2df   : > { %1447 = vst.msk [vmem:[%s2070_s10 + $0x140] sm:$0xff] %vm1406_vm1, %v1382_v1 }
 0x2e0   : > { %v1028_v2 = vpop.f32.mrf.mxu3 }
 0x2e1   : > { %v1029_v3 = vadd.f32 %v2219_v8, %v1028_v2 }
 0x2e2   : > { %v1273_v4 = vpop.f32.mrf.mxu2 }
 0x2e3   : > { %v1106_v9 = vmax.f32 %v1029_v3, 0.0  ;;  %v1274_v13 = vadd.f32 %v2056_v29, %v1273_v4 }
 0x2e5   : > { %v1383_v5 = vmax.f32 %v1274_v13, 0.0  ;;  %1320 = vmatmul.f32.gmra.mxu3 %v1106_v9 }
 0x2e7   : > { %1448 = vst.msk [vmem:[%s2070_s10 + $0x148] sm:$0xff] %vm1406_vm1, %v1383_v5 }
 0x2e8   : > { %v1031_v41 = vpop.f32.mrf.mxu3 }
 0x2e9   : > { %v1032_v15 = vadd.f32 %v2219_v8, %v1031_v41 }
 0x2ea   : > { %v1276_v6 = vpop.f32.mrf.mxu2 }
 0x2eb   : > { %v1107_v7 = vmax.f32 %v1032_v15, 0.0  ;;  %v1277_v16 = vadd.f32 %v2056_v29, %v1276_v6 }
 0x2ed   : > { %v1384_v54 = vmax.f32 %v1277_v16, 0.0  ;;  %1323 = vmatmul.f32.gmra.mxu3 %v1107_v7 }
 0x2ef   : > { %1449 = vst.msk [vmem:[%s2070_s10 + $0x150] sm:$0xff] %vm1406_vm1, %v1384_v54 }
 0x2f0   : > { %v1034_v17 = vpop.f32.mrf.mxu3 }
 0x2f1   : > { %v1035_v21 = vadd.f32 %v2219_v8, %v1034_v17 }
 0x2f2   : > { %v1279_v10 = vpop.f32.mrf.mxu2 }
 0x2f3   : > { %v1108_v23 = vmax.f32 %v1035_v21, 0.0  ;;  %v1280_v11 = vadd.f32 %v2056_v29, %v1279_v10 }
 0x2f5   : > { %v1385_v12 = vmax.f32 %v1280_v11, 0.0  ;;  %1326 = vmatmul.f32.gmra.mxu3 %v1108_v23 }
 0x2f7   : > { %1450 = vst.msk [vmem:[%s2070_s10 + $0x158] sm:$0xff] %vm1406_vm1, %v1385_v12 }
 0x2f8   : > { %v1037_v24 = vpop.f32.mrf.mxu3 }
 0x2f9   : > { %v1038_v14 = vadd.f32 %v2219_v8, %v1037_v24 }
 0x2fa   : > { %v1282_v25 = vpop.f32.mrf.mxu2 }
 0x2fb   : > { %v1109_v31 = vmax.f32 %v1038_v14, 0.0  ;;  %v1283_v18 = vadd.f32 %v2056_v29, %v1282_v25 }
 0x2fd   : > { %v1386_v32 = vmax.f32 %v1283_v18, 0.0  ;;  %1329 = vmatmul.f32.gmra.mxu3 %v1109_v31 }
 0x2ff   : > { %1451 = vst.msk [vmem:[%s2070_s10 + $0x160] sm:$0xff] %vm1406_vm1, %v1386_v32 }
 0x300   : > { %v1040_v19 = vpop.f32.mrf.mxu3 }
 0x301   : > { %v1041_v20 = vadd.f32 %v2219_v8, %v1040_v19 }
 0x302   : > { %v1285_v22 = vpop.f32.mrf.mxu2 }
 0x303   : > { %v1110_v33 = vmax.f32 %v1041_v20, 0.0  ;;  %v1286_v38 = vadd.f32 %v2314_v26, %v1285_v22 }
 0x305   : > { %v1387_v40 = vmax.f32 %v1286_v38, 0.0  ;;  %1332 = vmatmul.f32.gmra.mxu3 %v1110_v33 }
 0x307   : > { %1452 = vst.msk [vmem:[%s2070_s10 + $0x168] sm:$0xff] %vm1406_vm1, %v1387_v40 }
 0x308   : > { %v1043_v29 = vpop.f32.mrf.mxu3 }
 0x309   : > { %v1044_v27 = vadd.f32 %v2219_v8, %v1043_v29 }
 0x30a   : > { %v1288_v28 = vpop.f32.mrf.mxu2 }
 0x30b   : > { %v1111_v30 = vmax.f32 %v1044_v27, 0.0  ;;  %v1289_v34 = vadd.f32 %v2314_v26, %v1288_v28 }
 0x30d   : > { %v1388_v35 = vmax.f32 %v1289_v34, 0.0  ;;  %1335 = vmatmul.f32.gmra.mxu3 %v1111_v30 }
 0x30f   : > { %1453 = vst.msk [vmem:[%s2070_s10 + $0x170] sm:$0xff] %vm1406_vm1, %v1388_v35 }
 0x310   : > { %v1046_v37 = vpop.f32.mrf.mxu3 }
 0x311   : > { %v1047_v39 = vadd.f32 %v2219_v8, %v1046_v37 }
 0x312   : > { %v1291_v36 = vpop.f32.mrf.mxu2 }
 0x313   : > { %v1112_v42 = vmax.f32 %v1047_v39, 0.0  ;;  %v1292_v43 = vadd.f32 %v2314_v26, %v1291_v36 }
 0x315   : > { %v1389_v44 = vmax.f32 %v1292_v43, 0.0  ;;  %1338 = vmatmul.f32.gmra.mxu3 %v1112_v42 }
 0x317   : > { %1454 = vst.msk [vmem:[%s2070_s10 + $0x178] sm:$0xff] %vm1406_vm1, %v1389_v44 }
 0x320   : > { %v1294_v45 = vpop.f32.mrf.mxu3 }
 0x321   : > { %v1295_v46 = vadd.f32 %v2314_v26, %v1294_v45 }
 0x323   : > { %v1390_v47 = vmax.f32 %v1295_v46, 0.0 }
 0x325   : > { %1455 = vst.msk [vmem:[%s2070_s10 + $0x180] sm:$0xff] %vm1406_vm1, %v1390_v47 }
 0x328   : > { %v1297_v48 = vpop.f32.mrf.mxu3 }
 0x329   : > { %v1298_v8 = vadd.f32 %v2314_v26, %v1297_v48 }
 0x32b   : > { %v1391_v49 = vmax.f32 %v1298_v8, 0.0 }
 0x32d   : > { %1456 = vst.msk [vmem:[%s2070_s10 + $0x188] sm:$0xff] %vm1406_vm1, %v1391_v49 }
 0x330   : > { %v1300_v50 = vpop.f32.mrf.mxu3 }
 0x331   : > { %v1301_v51 = vadd.f32 %v2314_v26, %v1300_v50 }
 0x333   : > { %v1392_v52 = vmax.f32 %v1301_v51, 0.0 }
 0x335   : > { %1457 = vst.msk [vmem:[%s2070_s10 + $0x190] sm:$0xff] %vm1406_vm1, %v1392_v52 }
 0x338   : > { %v1303_v53 = vpop.f32.mrf.mxu3 }
 0x339   : > { %v1304_v55 = vadd.f32 %v2314_v26, %v1303_v53 }
 0x33b   : > { %v1393_v56 = vmax.f32 %v1304_v55, 0.0 }
 0x33d   : > { %1458 = vst.msk [vmem:[%s2070_s10 + $0x198] sm:$0xff] %vm1406_vm1, %v1393_v56 }
 0x340   : > { %v1306_v57 = vpop.f32.mrf.mxu3 }
 0x341   : > { %v1307_v58 = vadd.f32 %v2314_v26, %v1306_v57 }
 0x343   : > { %v1394_v59 = vmax.f32 %v1307_v58, 0.0 }
 0x345   : > { %1459 = vst.msk [vmem:[%s2070_s10 + $0x1a0] sm:$0xff] %vm1406_vm1, %v1394_v59 }
 0x348   : > { %v1309_v60 = vpop.f32.mrf.mxu3 }
 0x349   : > { %v1310_v61 = vadd.f32 %v2314_v26, %v1309_v60 }
 0x34b   : > { %v1395_v62 = vmax.f32 %v1310_v61, 0.0 }
 0x34d   : > { %1460 = vst.msk [vmem:[%s2070_s10 + $0x1a8] sm:$0xff] %vm1406_vm1, %v1395_v62 }
 0x350   : > { %v1312_v63 = vpop.f32.mrf.mxu3 }
 0x351   : > { %v1313_v0 = vadd.f32 %v2314_v26, %v1312_v63 }
 0x353   : > { %v1396_v1 = vmax.f32 %v1313_v0, 0.0 }
 0x355   : > { %1461 = vst.msk [vmem:[%s2070_s10 + $0x1b0] sm:$0xff] %vm1406_vm1, %v1396_v1 }
 0x358   : > { %v1315_v2 = vpop.f32.mrf.mxu3 }
 0x359   : > { %v1316_v3 = vadd.f32 %v2314_v26, %v1315_v2 }
 0x35b   : > { %v1397_v4 = vmax.f32 %v1316_v3, 0.0 }
 0x35d   : > { %1462 = vst.msk [vmem:[%s2070_s10 + $0x1b8] sm:$0xff] %vm1406_vm1, %v1397_v4 }
 0x360   : > { %v1318_v9 = vpop.f32.mrf.mxu3 }
 0x361   : > { %v1319_v13 = vadd.f32 %v2314_v26, %v1318_v9 }
 0x363   : > { %v1398_v5 = vmax.f32 %v1319_v13, 0.0 }
 0x365   : > { %1463 = vst.msk [vmem:[%s2070_s10 + $0x1c0] sm:$0xff] %vm1406_vm1, %v1398_v5 }
 0x368   : > { %v1321_v41 = vpop.f32.mrf.mxu3 }
 0x369   : > { %v1322_v15 = vadd.f32 %v2314_v26, %v1321_v41 }
 0x36b   : > { %v1399_v6 = vmax.f32 %v1322_v15, 0.0 }
 0x36d   : > { %1464 = vst.msk [vmem:[%s2070_s10 + $0x1c8] sm:$0xff] %vm1406_vm1, %v1399_v6 }
 0x370   : > { %v1324_v7 = vpop.f32.mrf.mxu3 }
 0x371   : > { %v1325_v16 = vadd.f32 %v2314_v26, %v1324_v7 }
 0x373   : > { %v1400_v54 = vmax.f32 %v1325_v16, 0.0 }
 0x375   : > { %1465 = vst.msk [vmem:[%s2070_s10 + $0x1d0] sm:$0xff] %vm1406_vm1, %v1400_v54 }
 0x378   : > { %v1327_v17 = vpop.f32.mrf.mxu3 }
 0x379   : > { %v1328_v21 = vadd.f32 %v2314_v26, %v1327_v17 }
 0x37b   : > { %v1401_v10 = vmax.f32 %v1328_v21, 0.0 }
 0x37d   : > { %1466 = vst.msk [vmem:[%s2070_s10 + $0x1d8] sm:$0xff] %vm1406_vm1, %v1401_v10 }
 0x380   : > { %v1330_v23 = vpop.f32.mrf.mxu3 }
 0x381   : > { %v1331_v11 = vadd.f32 %v2314_v26, %v1330_v23 }
 0x383   : > { %v1402_v12 = vmax.f32 %v1331_v11, 0.0 }
 0x385   : > { %1467 = vst.msk [vmem:[%s2070_s10 + $0x1e0] sm:$0xff] %vm1406_vm1, %v1402_v12 }
 0x388   : > { %v1333_v24 = vpop.f32.mrf.mxu3 }
 0x389   : > { %v1334_v14 = vadd.f32 %v2314_v26, %v1333_v24 }
 0x38b   : > { %v1403_v25 = vmax.f32 %v1334_v14, 0.0 }
 0x38d   : > { %1468 = vst.msk [vmem:[%s2070_s10 + $0x1e8] sm:$0xff] %vm1406_vm1, %v1403_v25 }
 0x390   : > { %v1336_v31 = vpop.f32.mrf.mxu3 }
 0x391   : > { %v1337_v18 = vadd.f32 %v2314_v26, %v1336_v31 }
 0x393   : > { %v1404_v32 = vmax.f32 %v1337_v18, 0.0 }
 0x395   : > { %1469 = vst.msk [vmem:[%s2070_s10 + $0x1f0] sm:$0xff] %vm1406_vm1, %v1404_v32 }
 0x398   : > { %v1339_v19 = vpop.f32.mrf.mxu3 }
 0x399   : > { %v1340_v20 = vadd.f32 %v2314_v26, %v1339_v19 }
 0x39b   : > { %v1405_v22 = vmax.f32 %v1340_v20, 0.0 }
 0x39d   : > { %1470 = vst.msk [vmem:[%s2070_s10 + $0x1f8] sm:$0xff] %vm1406_vm1, %v1405_v22 }
 0x39e PF: > { %s17_s24 = sadd.s32 1, %s1658_s24  }
 0x39f   : > { %p14_p4 = scmp.ge.s32.totalorder %s17_s24, 4  }
 0x3a1   :  { %16 = sbr.rel (!%p14_p4) target bundleno = 1 (0x1), region = 78 }

</bundles_post_ra>
